<compile_context>
chip_gen: v7x
topology: tpu7x:2x2x1
jax: 0.10.0
libtpu: 0.0.40
codegen_flags: <defaults>
</compile_context>

<pallas_src>
import math
import functools

import jax
import jax.numpy as jnp
from jax.experimental import pallas as pl
from jax.experimental.pallas import tpu as pltpu


def _mha_kernel(*refs, head, d_k, has_mask):
    """Fused MHA for one (batch, q-tile): q projection, per-head attention with
    softmax, head-concat into VMEM scratch, single output projection.  K/V
    projections are computed once per batch (q-tile == 0) into scratch."""
    if has_mask:
        (q_ref, k_ref, v_ref, mask_ref,
         wq_ref, bq_ref, wk_ref, bk_ref, wv_ref, bv_ref, wo_ref, bo_ref,
         out_ref, kproj_ref, vproj_ref, cat_ref) = refs
    else:
        (q_ref, k_ref, v_ref,
         wq_ref, bq_ref, wk_ref, bk_ref, wv_ref, bv_ref, wo_ref, bo_ref,
         out_ref, kproj_ref, vproj_ref, cat_ref) = refs
        mask_ref = None

    # ---- K/V projection: once per batch (q-tile grid axis is "arbitrary"). ----
    @pl.when(pl.program_id(1) == 0)
    def _():
        xk = k_ref[0].astype(jnp.bfloat16)          # (S, E)
        xv = v_ref[0].astype(jnp.bfloat16)          # (S, E)
        k = jnp.dot(xk, wk_ref[...], preferred_element_type=jnp.float32) + bk_ref[...]
        v = jnp.dot(xv, wv_ref[...], preferred_element_type=jnp.float32) + bv_ref[...]
        kproj_ref[...] = k.astype(jnp.bfloat16)
        vproj_ref[...] = v.astype(jnp.bfloat16)

    # ---- Q projection for this tile (wq/bq pre-scaled by 1/sqrt(d_k)). ----
    xq = q_ref[0].astype(jnp.bfloat16)              # (TQ, E)
    q = jnp.dot(xq, wq_ref[...], preferred_element_type=jnp.float32) + bq_ref[...]

    if has_mask:
        # Compact int8 mask -> additive f32 mask, on the VPU (slack unit).
        mask_add = jnp.where(mask_ref[0].astype(jnp.float32) == 0.0,
                             jnp.float32(-1e9), jnp.float32(0.0))  # (TQ, S)

    k_all = kproj_ref[...]                          # (S, E) bf16
    v_all = vproj_ref[...]                          # (S, E) bf16

    # Contract last dims of q_h / k_h -> no materialized k_h.T (no XLU transpose).
    qk_dims = (((1,), (1,)), ((), ()))

    for h in range(head):                           # static unroll (small H)
        sl = slice(h * d_k, (h + 1) * d_k)
        qh = q[:, sl].astype(jnp.bfloat16)          # (TQ, d_k)
        scores = jax.lax.dot_general(qh, k_all[:, sl], qk_dims,
                                     preferred_element_type=jnp.float32)  # (TQ, S)
        if has_mask:
            scores = scores + mask_add
        m = jnp.max(scores, axis=-1, keepdims=True)
        e = jnp.exp(scores - m)
        denom = jnp.sum(e, axis=-1, keepdims=True)
        p = (e * pl.reciprocal(denom, approx=True)).astype(jnp.bfloat16)
        # Head output straight into the concat buffer; no per-head wo matmul.
        cat_ref[:, sl] = jnp.dot(p, v_all[:, sl],
                                 preferred_element_type=jnp.float32)  # (TQ, d_k)

    # Single E-deep output projection (full MXU depth) + bias.
    out = jnp.dot(cat_ref[...].astype(jnp.bfloat16), wo_ref[...],
                  preferred_element_type=jnp.float32) + bo_ref[...]
    out_ref[0] = out.astype(out_ref.dtype)


def _pick_tiles(seq_len):
    """Returns (padded_seq_len, q_tile).  Pads long, non-128-multiple sequences
    so q-tiling / megacore parallelism is preserved."""
    if seq_len <= 128:
        return seq_len, seq_len
    s_pad = ((seq_len + 127) // 128) * 128
    # 256-wide q tiles amortize per-grid-step overhead and fill the MXU's M dim;
    # sweep per generation (cap at 128-256 on v7x's 64 MiB VMEM).
    tq = 256 if s_pad % 256 == 0 else 128
    return s_pad, tq


def multi_headed_attention(query, key, value, params, mask=None, *, head):
    """params = (wq, bq, wk, bk, wv, bv, wo, bo); weights are (in, out); biases
    are (1, E).  mask may be (S, S), (1, S, S) or (B, S, S); 0 -> masked."""
    B, S, E = query.shape
    assert E % head == 0
    d_k = E // head
    s_pad, tq = _pick_tiles(S)
    n_q = s_pad // tq

    wq, bq, wk, bk, wv, bv, wo, bo = params

    # Fold the 1/sqrt(d_k) score scale into the q projection; bf16 MXU operands.
    scale = 1.0 / math.sqrt(d_k)
    wq_s = (wq * scale).astype(jnp.bfloat16)
    bq_s = (bq * scale).astype(jnp.float32)
    wk_b = wk.astype(jnp.bfloat16)
    wv_b = wv.astype(jnp.bfloat16)
    wo_b = wo.astype(jnp.bfloat16)
    bk_f = bk.astype(jnp.float32)
    bv_f = bv.astype(jnp.float32)
    bo_f = bo.astype(jnp.float32)

    # Compact int8 mask at its natural batch size (1 or B); no f32 B-broadcast.
    if mask is not None:
        m = jnp.asarray(mask).reshape((-1, S, S))
        mask_i8 = (m != 0).astype(jnp.int8)
    else:
        mask_i8 = None

    q_in, k_in, v_in = query, key, value
    if s_pad != S:
        pad = s_pad - S
        q_in = jnp.pad(q_in, ((0, 0), (0, pad), (0, 0)))
        k_in = jnp.pad(k_in, ((0, 0), (0, pad), (0, 0)))
        v_in = jnp.pad(v_in, ((0, 0), (0, pad), (0, 0)))
        if mask_i8 is None:
            mask_i8 = jnp.ones((1, S, S), jnp.int8)
        mask_i8 = jnp.pad(mask_i8, ((0, 0), (0, pad), (0, pad)))  # pad keys masked

    has_mask = mask_i8 is not None
    kernel = functools.partial(_mha_kernel, head=head, d_k=d_k, has_mask=has_mask)

    q_spec = pl.BlockSpec((1, tq, E), lambda b, qi: (b, qi, 0))
    # K/V block index only changes with b -> DMA'd once per batch, not per q-tile.
    kv_spec = pl.BlockSpec((1, s_pad, E), lambda b, qi: (b, 0, 0))
    w_spec = pl.BlockSpec((E, E), lambda b, qi: (0, 0))
    b_spec = pl.BlockSpec((1, E), lambda b, qi: (0, 0))
    out_spec = pl.BlockSpec((1, tq, E), lambda b, qi: (b, qi, 0))

    in_specs = [q_spec, kv_spec, kv_spec]
    inputs = [q_in, k_in, v_in]
    if has_mask:
        if mask_i8.shape[0] == 1:
            mask_spec = pl.BlockSpec((1, tq, s_pad), lambda b, qi: (0, qi, 0))
        else:
            mask_spec = pl.BlockSpec((1, tq, s_pad), lambda b, qi: (b, qi, 0))
        in_specs.append(mask_spec)
        inputs.append(mask_i8)
    in_specs += [w_spec, b_spec, w_spec, b_spec, w_spec, b_spec, w_spec, b_spec]
    inputs += [wq_s, bq_s, wk_b, bk_f, wv_b, bv_f, wo_b, bo_f]

    out = pl.pallas_call(
        kernel,
        out_shape=jax.ShapeDtypeStruct((B, s_pad, E), query.dtype),
        grid=(B, n_q),
        in_specs=in_specs,
        out_specs=out_spec,
        scratch_shapes=[
            pltpu.VMEM((s_pad, E), jnp.bfloat16),   # projected K (per batch)
            pltpu.VMEM((s_pad, E), jnp.bfloat16),   # projected V (per batch)
            pltpu.VMEM((tq, E), jnp.float32),       # per-q-tile head concat
        ],
        compiler_params=pltpu.CompilerParams(
            dimension_semantics=("parallel", "arbitrary"),
            vmem_limit_bytes=56 * 1024 * 1024),
    )(*inputs)

    if s_pad != S:
        out = out[:, :S, :]
    return out


def _init_linear_params(key, embedding_dim):
    """Deterministic nn.Linear-style init: U(-1/sqrt(in), 1/sqrt(in)).
    Weight returned as (in, out); bias as (1, out)."""
    bound = 1.0 / math.sqrt(embedding_dim)
    kw, kb = jax.random.split(key)
    w = jax.random.uniform(kw, (embedding_dim, embedding_dim), jnp.float32,
                           minval=-bound, maxval=bound)
    b = jax.random.uniform(kb, (1, embedding_dim), jnp.float32,
                           minval=-bound, maxval=bound)
    return w, b


def _reference_mha(query, key, value, params, mask, head):
    """Pure-JAX (f32) mirror of the PyTorch forward (dropout = identity)."""
    B, S, E = query.shape
    d_k = E // head
    wq, bq, wk, bk, wv, bv, wo, bo = params

    def split_heads(x):
        return x.reshape(B, S, head, d_k).transpose(0, 2, 1, 3)  # (B, H, S, d_k)

    q = split_heads(query @ wq + bq)
    k = split_heads(key @ wk + bk)
    v = split_heads(value @ wv + bv)

    scores = jnp.einsum("bhqd,bhkd->bhqk", q, k) / math.sqrt(d_k)
    if mask is not None:
        m = jnp.broadcast_to(jnp.asarray(mask).reshape((-1, S, S)), (B, S, S))
        scores = jnp.where(m[:, None] == 0, -1e9, scores)
    p = jax.nn.softmax(scores, axis=-1)
    x = jnp.einsum("bhqk,bhkd->bhqd", p, v)
    x = x.transpose(0, 2, 1, 3).reshape(B, S, E)
    return x @ wo + bo


if __name__ == "__main__":
    B, S, E, H = 2, 8, 32, 4  # batch, seq, embedding_dim, heads (d_k = 8)

    root = jax.random.PRNGKey(0)
    kq, kk, kv, km, kp = jax.random.split(root, 5)

    query = jax.random.normal(kq, (B, S, E), jnp.float32)
    key_in = jax.random.normal(kk, (B, S, E), jnp.float32)
    value = jax.random.normal(kv, (B, S, E), jnp.float32)
    # Batch-shared mask (1, S, S), the common usage of this module.
    mask = (jax.random.uniform(km, (1, S, S)) > 0.2).astype(jnp.int32)

    pkeys = jax.random.split(kp, 4)
    params = []
    for pk in pkeys:  # 4 Linear(E, E): q-proj, k-proj, v-proj, out-proj
        w, b = _init_linear_params(pk, E)
        params.extend([w, b])
    params = tuple(params)

    # Masked path.
    out_masked = multi_headed_attention(query, key_in, value, params,
                                        mask=mask, head=H)
    out_masked = jax.block_until_ready(out_masked)
    ref_masked = _reference_mha(query, key_in, value, params, mask, H)
    assert out_masked.shape == (B, S, E) and out_masked.dtype == jnp.float32
    # Tolerance reflects bf16 MXU operands (f32 accumulate) + approx reciprocal.
    assert jnp.allclose(out_masked, ref_masked, atol=5e-2, rtol=5e-2), \
        "masked output mismatch vs pure-JAX reference"

    # Mask-free specialization.
    out_nomask = multi_headed_attention(query, key_in, value, params,
                                        mask=None, head=H)
    out_nomask = jax.block_until_ready(out_nomask)
    ref_nomask = _reference_mha(query, key_in, value, params, None, H)
    assert jnp.allclose(out_nomask, ref_nomask, atol=5e-2, rtol=5e-2), \
        "mask-free output mismatch vs pure-JAX reference"

    print("KERNEL_OK")
</pallas_src>

<mosaic_0001>
module attributes {stable_mosaic.version = 11 : i64} {
  func.func @_mha_kernel(%arg0: i32, %arg1: i32, %arg2: memref<1x8x32xf32, #tpu.memory_space<vmem>>, %arg3: memref<1x8x32xf32, #tpu.memory_space<vmem>>, %arg4: memref<1x8x32xf32, #tpu.memory_space<vmem>>, %arg5: memref<1x8x8xi8, #tpu.memory_space<vmem>>, %arg6: memref<32x32xbf16, #tpu.memory_space<vmem>>, %arg7: memref<1x32xf32, #tpu.memory_space<vmem>>, %arg8: memref<32x32xbf16, #tpu.memory_space<vmem>>, %arg9: memref<1x32xf32, #tpu.memory_space<vmem>>, %arg10: memref<32x32xbf16, #tpu.memory_space<vmem>>, %arg11: memref<1x32xf32, #tpu.memory_space<vmem>>, %arg12: memref<32x32xbf16, #tpu.memory_space<vmem>>, %arg13: memref<1x32xf32, #tpu.memory_space<vmem>>, %arg14: memref<1x8x32xf32, #tpu.memory_space<vmem>>, %arg15: memref<8x32xbf16, #tpu.memory_space<vmem>>, %arg16: memref<8x32xbf16, #tpu.memory_space<vmem>>, %arg17: memref<8x32xf32, #tpu.memory_space<vmem>>) attributes {dimension_semantics = [#tpu.dimension_semantics<parallel>, #tpu.dimension_semantics<arbitrary>], iteration_bounds = array<i64: 2, 1>, scalar_prefetch = 0 : i64, scratch_operands = 3 : i64, tpu.core_type = #tpu.core_type<tc>, window_params = [{transform_indices = @transform_0, window_bounds = array<i64: 1, 8, 32>}, {transform_indices = @transform_1, window_bounds = array<i64: 1, 8, 32>}, {transform_indices = @transform_2, window_bounds = array<i64: 1, 8, 32>}, {transform_indices = @transform_3, window_bounds = array<i64: 1, 8, 8>}, {pipeline_mode = #tpu.pipeline_mode<synchronous>, transform_indices = @transform_4, window_bounds = array<i64: 32, 32>}, {pipeline_mode = #tpu.pipeline_mode<synchronous>, transform_indices = @transform_5, window_bounds = array<i64: 1, 32>}, {pipeline_mode = #tpu.pipeline_mode<synchronous>, transform_indices = @transform_6, window_bounds = array<i64: 32, 32>}, {pipeline_mode = #tpu.pipeline_mode<synchronous>, transform_indices = @transform_7, window_bounds = array<i64: 1, 32>}, {pipeline_mode = #tpu.pipeline_mode<synchronous>, transform_indices = @transform_8, window_bounds = array<i64: 32, 32>}, {pipeline_mode = #tpu.pipeline_mode<synchronous>, transform_indices = @transform_9, window_bounds = array<i64: 1, 32>}, {pipeline_mode = #tpu.pipeline_mode<synchronous>, transform_indices = @transform_10, window_bounds = array<i64: 32, 32>}, {pipeline_mode = #tpu.pipeline_mode<synchronous>, transform_indices = @transform_11, window_bounds = array<i64: 1, 32>}, {transform_indices = @transform_12, window_bounds = array<i64: 1, 8, 32>}]} {
    %c0_i32 = arith.constant 0 : i32
    %0 = arith.cmpi eq, %arg1, %c0_i32 : i32
    %1 = arith.extui %0 : i1 to i32
    %c0_i32_0 = arith.constant 0 : i32
    %2 = arith.cmpi ne, %1, %c0_i32_0 : i32
    scf.if %2 {
      %c0_48 = arith.constant 0 : index
      %c0_49 = arith.constant 0 : index
      %c0_50 = arith.constant 0 : index
      %107 = vector.load %arg3[%c0_48, %c0_49, %c0_50] : memref<1x8x32xf32, #tpu.memory_space<vmem>>, vector<1x8x32xf32>
      %108 = vector.shape_cast %107 : vector<1x8x32xf32> to vector<8x32xf32>
      %109 = arith.truncf %108 : vector<8x32xf32> to vector<8x32xbf16>
      %c0_51 = arith.constant 0 : index
      %c0_52 = arith.constant 0 : index
      %c0_53 = arith.constant 0 : index
      %110 = vector.load %arg4[%c0_51, %c0_52, %c0_53] : memref<1x8x32xf32, #tpu.memory_space<vmem>>, vector<1x8x32xf32>
      %111 = vector.shape_cast %110 : vector<1x8x32xf32> to vector<8x32xf32>
      %112 = arith.truncf %111 : vector<8x32xf32> to vector<8x32xbf16>
      %c0_54 = arith.constant 0 : index
      %c0_55 = arith.constant 0 : index
      %113 = vector.load %arg8[%c0_54, %c0_55] : memref<32x32xbf16, #tpu.memory_space<vmem>>, vector<32x32xbf16>
      %cst_56 = arith.constant dense<0.000000e+00> : vector<8x32xf32>
      %114 = tpu.matmul %109, %113, %cst_56 {dimension_numbers = #tpu.dot_dimension_numbers<[1], [0], [0], [1], [0, 0, 1, 1], [], []>} : vector<8x32xbf16>, vector<32x32xbf16>, vector<8x32xf32> -> vector<8x32xf32>
      %c0_57 = arith.constant 0 : index
      %c0_58 = arith.constant 0 : index
      %115 = vector.load %arg9[%c0_57, %c0_58] : memref<1x32xf32, #tpu.memory_space<vmem>>, vector<1x32xf32>
      %116 = vector.broadcast %115 : vector<1x32xf32> to vector<8x32xf32>
      %117 = arith.addf %114, %116 : vector<8x32xf32>
      %c0_59 = arith.constant 0 : index
      %c0_60 = arith.constant 0 : index
      %118 = vector.load %arg10[%c0_59, %c0_60] : memref<32x32xbf16, #tpu.memory_space<vmem>>, vector<32x32xbf16>
      %cst_61 = arith.constant dense<0.000000e+00> : vector<8x32xf32>
      %119 = tpu.matmul %112, %118, %cst_61 {dimension_numbers = #tpu.dot_dimension_numbers<[1], [0], [0], [1], [0, 0, 1, 1], [], []>} : vector<8x32xbf16>, vector<32x32xbf16>, vector<8x32xf32> -> vector<8x32xf32>
      %c0_62 = arith.constant 0 : index
      %c0_63 = arith.constant 0 : index
      %120 = vector.load %arg11[%c0_62, %c0_63] : memref<1x32xf32, #tpu.memory_space<vmem>>, vector<1x32xf32>
      %121 = vector.broadcast %120 : vector<1x32xf32> to vector<8x32xf32>
      %122 = arith.addf %119, %121 : vector<8x32xf32>
      %123 = arith.truncf %117 : vector<8x32xf32> to vector<8x32xbf16>
      %c0_64 = arith.constant 0 : index
      %c0_65 = arith.constant 0 : index
      %124 = vector.load %arg15[%c0_64, %c0_65] : memref<8x32xbf16, #tpu.memory_space<vmem>>, vector<8x32xbf16>
      tpu.vector_store %arg15[%c0_64, %c0_65], %123 {strides = array<i32>} : memref<8x32xbf16, #tpu.memory_space<vmem>>, vector<8x32xbf16>,
      %125 = arith.truncf %122 : vector<8x32xf32> to vector<8x32xbf16>
      %c0_66 = arith.constant 0 : index
      %c0_67 = arith.constant 0 : index
      %126 = vector.load %arg16[%c0_66, %c0_67] : memref<8x32xbf16, #tpu.memory_space<vmem>>, vector<8x32xbf16>
      tpu.vector_store %arg16[%c0_66, %c0_67], %125 {strides = array<i32>} : memref<8x32xbf16, #tpu.memory_space<vmem>>, vector<8x32xbf16>,
    } else {
    }
    %c0 = arith.constant 0 : index
    %c0_1 = arith.constant 0 : index
    %c0_2 = arith.constant 0 : index
    %3 = vector.load %arg2[%c0, %c0_1, %c0_2] : memref<1x8x32xf32, #tpu.memory_space<vmem>>, vector<1x8x32xf32>
    %4 = vector.shape_cast %3 : vector<1x8x32xf32> to vector<8x32xf32>
    %5 = arith.truncf %4 : vector<8x32xf32> to vector<8x32xbf16>
    %c0_3 = arith.constant 0 : index
    %c0_4 = arith.constant 0 : index
    %6 = vector.load %arg6[%c0_3, %c0_4] : memref<32x32xbf16, #tpu.memory_space<vmem>>, vector<32x32xbf16>
    %cst = arith.constant dense<0.000000e+00> : vector<8x32xf32>
    %7 = tpu.matmul %5, %6, %cst {dimension_numbers = #tpu.dot_dimension_numbers<[1], [0], [0], [1], [0, 0, 1, 1], [], []>} : vector<8x32xbf16>, vector<32x32xbf16>, vector<8x32xf32> -> vector<8x32xf32>
    %c0_5 = arith.constant 0 : index
    %c0_6 = arith.constant 0 : index
    %8 = vector.load %arg7[%c0_5, %c0_6] : memref<1x32xf32, #tpu.memory_space<vmem>>, vector<1x32xf32>
    %9 = vector.broadcast %8 : vector<1x32xf32> to vector<8x32xf32>
    %10 = arith.addf %7, %9 : vector<8x32xf32>
    %c0_7 = arith.constant 0 : index
    %c0_8 = arith.constant 0 : index
    %c0_9 = arith.constant 0 : index
    %11 = vector.load %arg5[%c0_7, %c0_8, %c0_9] : memref<1x8x8xi8, #tpu.memory_space<vmem>>, vector<1x8x8xi8>
    %12 = vector.shape_cast %11 : vector<1x8x8xi8> to vector<8x8xi8>
    %13 = arith.sitofp %12 : vector<8x8xi8> to vector<8x8xf32>
    %cst_10 = arith.constant 0.000000e+00 : f32
    %14 = vector.broadcast %cst_10 : f32 to vector<8x8xf32>
    %15 = arith.cmpf oeq, %13, %14 : vector<8x8xf32>
    %cst_11 = arith.constant -1.000000e+09 : f32
    %cst_12 = arith.constant 0.000000e+00 : f32
    %16 = vector.broadcast %cst_11 : f32 to vector<8x8xf32>
    %17 = vector.broadcast %cst_12 : f32 to vector<8x8xf32>
    %18 = arith.select %15, %16, %17 : vector<8x8xi1>, vector<8x8xf32>
    %c0_13 = arith.constant 0 : index
    %c0_14 = arith.constant 0 : index
    %19 = vector.load %arg15[%c0_13, %c0_14] : memref<8x32xbf16, #tpu.memory_space<vmem>>, vector<8x32xbf16>
    %c0_15 = arith.constant 0 : index
    %c0_16 = arith.constant 0 : index
    %20 = vector.load %arg16[%c0_15, %c0_16] : memref<8x32xbf16, #tpu.memory_space<vmem>>, vector<8x32xbf16>
    %21 = vector.extract_strided_slice %10 {offsets = [0, 0], sizes = [8, 8], strides = [1, 1]} : vector<8x32xf32> to vector<8x8xf32>
    %22 = arith.truncf %21 : vector<8x8xf32> to vector<8x8xbf16>
    %23 = vector.extract_strided_slice %19 {offsets = [0, 0], sizes = [8, 8], strides = [1, 1]} : vector<8x32xbf16> to vector<8x8xbf16>
    %cst_17 = arith.constant dense<0.000000e+00> : vector<8x8xf32>
    %24 = tpu.matmul %22, %23, %cst_17 {dimension_numbers = #tpu.dot_dimension_numbers<[1], [1], [0], [0], [0, 0, 1, 0], [], []>} : vector<8x8xbf16>, vector<8x8xbf16>, vector<8x8xf32> -> vector<8x8xf32>
    %25 = arith.addf %24, %18 : vector<8x8xf32>
    %cst_18 = arith.constant dense<0xFF800000> : vector<8xf32>
    %26 = vector.multi_reduction <maximumf>, %25, %cst_18 [1] : vector<8x8xf32> to vector<8xf32>
    %27 = vector.shape_cast %26 : vector<8xf32> to vector<8x1xf32>
    %28 = vector.broadcast %27 : vector<8x1xf32> to vector<8x8xf32>
    %29 = arith.subf %25, %28 : vector<8x8xf32>
    %30 = math.exp %29 : vector<8x8xf32>
    %cst_19 = arith.constant dense<0.000000e+00> : vector<8xf32>
    %31 = vector.multi_reduction <add>, %30, %cst_19 [1] : vector<8x8xf32> to vector<8xf32>
    %32 = vector.shape_cast %31 : vector<8xf32> to vector<8x1xf32>
    %33 = tpu.reciprocal %32 {approx = true} : vector<8x1xf32> -> vector<8x1xf32>
    %34 = vector.broadcast %33 : vector<8x1xf32> to vector<8x8xf32>
    %35 = arith.mulf %30, %34 : vector<8x8xf32>
    %36 = arith.truncf %35 : vector<8x8xf32> to vector<8x8xbf16>
    %37 = vector.extract_strided_slice %20 {offsets = [0, 0], sizes = [8, 8], strides = [1, 1]} : vector<8x32xbf16> to vector<8x8xbf16>
    %cst_20 = arith.constant dense<0.000000e+00> : vector<8x8xf32>
    %38 = tpu.matmul %36, %37, %cst_20 {dimension_numbers = #tpu.dot_dimension_numbers<[1], [0], [0], [1], [0, 0, 1, 1], [], []>} : vector<8x8xbf16>, vector<8x8xbf16>, vector<8x8xf32> -> vector<8x8xf32>
    %c0_21 = arith.constant 0 : index
    %c0_22 = arith.constant 0 : index
    %39 = vector.load %arg17[%c0_21, %c0_22] : memref<8x32xf32, #tpu.memory_space<vmem>>, vector<8x8xf32>
    tpu.vector_store %arg17[%c0_21, %c0_22], %38 {strides = array<i32>} : memref<8x32xf32, #tpu.memory_space<vmem>>, vector<8x8xf32>,
    %40 = vector.extract_strided_slice %10 {offsets = [0, 8], sizes = [8, 8], strides = [1, 1]} : vector<8x32xf32> to vector<8x8xf32>
    %41 = arith.truncf %40 : vector<8x8xf32> to vector<8x8xbf16>
    %42 = vector.extract_strided_slice %19 {offsets = [0, 8], sizes = [8, 8], strides = [1, 1]} : vector<8x32xbf16> to vector<8x8xbf16>
    %cst_23 = arith.constant dense<0.000000e+00> : vector<8x8xf32>
    %43 = tpu.matmul %41, %42, %cst_23 {dimension_numbers = #tpu.dot_dimension_numbers<[1], [1], [0], [0], [0, 0, 1, 0], [], []>} : vector<8x8xbf16>, vector<8x8xbf16>, vector<8x8xf32> -> vector<8x8xf32>
    %44 = arith.addf %43, %18 : vector<8x8xf32>
    %cst_24 = arith.constant dense<0xFF800000> : vector<8xf32>
    %45 = vector.multi_reduction <maximumf>, %44, %cst_24 [1] : vector<8x8xf32> to vector<8xf32>
    %46 = vector.shape_cast %45 : vector<8xf32> to vector<8x1xf32>
    %47 = vector.broadcast %46 : vector<8x1xf32> to vector<8x8xf32>
    %48 = arith.subf %44, %47 : vector<8x8xf32>
    %49 = math.exp %48 : vector<8x8xf32>
    %cst_25 = arith.constant dense<0.000000e+00> : vector<8xf32>
    %50 = vector.multi_reduction <add>, %49, %cst_25 [1] : vector<8x8xf32> to vector<8xf32>
    %51 = vector.shape_cast %50 : vector<8xf32> to vector<8x1xf32>
    %52 = tpu.reciprocal %51 {approx = true} : vector<8x1xf32> -> vector<8x1xf32>
    %53 = vector.broadcast %52 : vector<8x1xf32> to vector<8x8xf32>
    %54 = arith.mulf %49, %53 : vector<8x8xf32>
    %55 = arith.truncf %54 : vector<8x8xf32> to vector<8x8xbf16>
    %56 = vector.extract_strided_slice %20 {offsets = [0, 8], sizes = [8, 8], strides = [1, 1]} : vector<8x32xbf16> to vector<8x8xbf16>
    %cst_26 = arith.constant dense<0.000000e+00> : vector<8x8xf32>
    %57 = tpu.matmul %55, %56, %cst_26 {dimension_numbers = #tpu.dot_dimension_numbers<[1], [0], [0], [1], [0, 0, 1, 1], [], []>} : vector<8x8xbf16>, vector<8x8xbf16>, vector<8x8xf32> -> vector<8x8xf32>
    %c0_27 = arith.constant 0 : index
    %c8 = arith.constant 8 : index
    %58 = vector.load %arg17[%c0_27, %c8] : memref<8x32xf32, #tpu.memory_space<vmem>>, vector<8x8xf32>
    tpu.vector_store %arg17[%c0_27, %c8], %57 {strides = array<i32>} : memref<8x32xf32, #tpu.memory_space<vmem>>, vector<8x8xf32>,
    %59 = vector.extract_strided_slice %10 {offsets = [0, 16], sizes = [8, 8], strides = [1, 1]} : vector<8x32xf32> to vector<8x8xf32>
    %60 = arith.truncf %59 : vector<8x8xf32> to vector<8x8xbf16>
    %61 = vector.extract_strided_slice %19 {offsets = [0, 16], sizes = [8, 8], strides = [1, 1]} : vector<8x32xbf16> to vector<8x8xbf16>
    %cst_28 = arith.constant dense<0.000000e+00> : vector<8x8xf32>
    %62 = tpu.matmul %60, %61, %cst_28 {dimension_numbers = #tpu.dot_dimension_numbers<[1], [1], [0], [0], [0, 0, 1, 0], [], []>} : vector<8x8xbf16>, vector<8x8xbf16>, vector<8x8xf32> -> vector<8x8xf32>
    %63 = arith.addf %62, %18 : vector<8x8xf32>
    %cst_29 = arith.constant dense<0xFF800000> : vector<8xf32>
    %64 = vector.multi_reduction <maximumf>, %63, %cst_29 [1] : vector<8x8xf32> to vector<8xf32>
    %65 = vector.shape_cast %64 : vector<8xf32> to vector<8x1xf32>
    %66 = vector.broadcast %65 : vector<8x1xf32> to vector<8x8xf32>
    %67 = arith.subf %63, %66 : vector<8x8xf32>
    %68 = math.exp %67 : vector<8x8xf32>
    %cst_30 = arith.constant dense<0.000000e+00> : vector<8xf32>
    %69 = vector.multi_reduction <add>, %68, %cst_30 [1] : vector<8x8xf32> to vector<8xf32>
    %70 = vector.shape_cast %69 : vector<8xf32> to vector<8x1xf32>
    %71 = tpu.reciprocal %70 {approx = true} : vector<8x1xf32> -> vector<8x1xf32>
    %72 = vector.broadcast %71 : vector<8x1xf32> to vector<8x8xf32>
    %73 = arith.mulf %68, %72 : vector<8x8xf32>
    %74 = arith.truncf %73 : vector<8x8xf32> to vector<8x8xbf16>
    %75 = vector.extract_strided_slice %20 {offsets = [0, 16], sizes = [8, 8], strides = [1, 1]} : vector<8x32xbf16> to vector<8x8xbf16>
    %cst_31 = arith.constant dense<0.000000e+00> : vector<8x8xf32>
    %76 = tpu.matmul %74, %75, %cst_31 {dimension_numbers = #tpu.dot_dimension_numbers<[1], [0], [0], [1], [0, 0, 1, 1], [], []>} : vector<8x8xbf16>, vector<8x8xbf16>, vector<8x8xf32> -> vector<8x8xf32>
    %c0_32 = arith.constant 0 : index
    %c16 = arith.constant 16 : index
    %77 = vector.load %arg17[%c0_32, %c16] : memref<8x32xf32, #tpu.memory_space<vmem>>, vector<8x8xf32>
    tpu.vector_store %arg17[%c0_32, %c16], %76 {strides = array<i32>} : memref<8x32xf32, #tpu.memory_space<vmem>>, vector<8x8xf32>,
    %78 = vector.extract_strided_slice %10 {offsets = [0, 24], sizes = [8, 8], strides = [1, 1]} : vector<8x32xf32> to vector<8x8xf32>
    %79 = arith.truncf %78 : vector<8x8xf32> to vector<8x8xbf16>
    %80 = vector.extract_strided_slice %19 {offsets = [0, 24], sizes = [8, 8], strides = [1, 1]} : vector<8x32xbf16> to vector<8x8xbf16>
    %cst_33 = arith.constant dense<0.000000e+00> : vector<8x8xf32>
    %81 = tpu.matmul %79, %80, %cst_33 {dimension_numbers = #tpu.dot_dimension_numbers<[1], [1], [0], [0], [0, 0, 1, 0], [], []>} : vector<8x8xbf16>, vector<8x8xbf16>, vector<8x8xf32> -> vector<8x8xf32>
    %82 = arith.addf %81, %18 : vector<8x8xf32>
    %cst_34 = arith.constant dense<0xFF800000> : vector<8xf32>
    %83 = vector.multi_reduction <maximumf>, %82, %cst_34 [1] : vector<8x8xf32> to vector<8xf32>
    %84 = vector.shape_cast %83 : vector<8xf32> to vector<8x1xf32>
    %85 = vector.broadcast %84 : vector<8x1xf32> to vector<8x8xf32>
    %86 = arith.subf %82, %85 : vector<8x8xf32>
    %87 = math.exp %86 : vector<8x8xf32>
    %cst_35 = arith.constant dense<0.000000e+00> : vector<8xf32>
    %88 = vector.multi_reduction <add>, %87, %cst_35 [1] : vector<8x8xf32> to vector<8xf32>
    %89 = vector.shape_cast %88 : vector<8xf32> to vector<8x1xf32>
    %90 = tpu.reciprocal %89 {approx = true} : vector<8x1xf32> -> vector<8x1xf32>
    %91 = vector.broadcast %90 : vector<8x1xf32> to vector<8x8xf32>
    %92 = arith.mulf %87, %91 : vector<8x8xf32>
    %93 = arith.truncf %92 : vector<8x8xf32> to vector<8x8xbf16>
    %94 = vector.extract_strided_slice %20 {offsets = [0, 24], sizes = [8, 8], strides = [1, 1]} : vector<8x32xbf16> to vector<8x8xbf16>
    %cst_36 = arith.constant dense<0.000000e+00> : vector<8x8xf32>
    %95 = tpu.matmul %93, %94, %cst_36 {dimension_numbers = #tpu.dot_dimension_numbers<[1], [0], [0], [1], [0, 0, 1, 1], [], []>} : vector<8x8xbf16>, vector<8x8xbf16>, vector<8x8xf32> -> vector<8x8xf32>
    %c0_37 = arith.constant 0 : index
    %c24 = arith.constant 24 : index
    %96 = vector.load %arg17[%c0_37, %c24] : memref<8x32xf32, #tpu.memory_space<vmem>>, vector<8x8xf32>
    tpu.vector_store %arg17[%c0_37, %c24], %95 {strides = array<i32>} : memref<8x32xf32, #tpu.memory_space<vmem>>, vector<8x8xf32>,
    %c0_38 = arith.constant 0 : index
    %c0_39 = arith.constant 0 : index
    %97 = vector.load %arg17[%c0_38, %c0_39] : memref<8x32xf32, #tpu.memory_space<vmem>>, vector<8x32xf32>
    %98 = arith.truncf %97 : vector<8x32xf32> to vector<8x32xbf16>
    %c0_40 = arith.constant 0 : index
    %c0_41 = arith.constant 0 : index
    %99 = vector.load %arg12[%c0_40, %c0_41] : memref<32x32xbf16, #tpu.memory_space<vmem>>, vector<32x32xbf16>
    %cst_42 = arith.constant dense<0.000000e+00> : vector<8x32xf32>
    %100 = tpu.matmul %98, %99, %cst_42 {dimension_numbers = #tpu.dot_dimension_numbers<[1], [0], [0], [1], [0, 0, 1, 1], [], []>} : vector<8x32xbf16>, vector<32x32xbf16>, vector<8x32xf32> -> vector<8x32xf32>
    %c0_43 = arith.constant 0 : index
    %c0_44 = arith.constant 0 : index
    %101 = vector.load %arg13[%c0_43, %c0_44] : memref<1x32xf32, #tpu.memory_space<vmem>>, vector<1x32xf32>
    %102 = vector.broadcast %101 : vector<1x32xf32> to vector<8x32xf32>
    %103 = arith.addf %100, %102 : vector<8x32xf32>
    %c0_45 = arith.constant 0 : index
    %c0_46 = arith.constant 0 : index
    %c0_47 = arith.constant 0 : index
    %104 = vector.load %arg14[%c0_45, %c0_46, %c0_47] : memref<1x8x32xf32, #tpu.memory_space<vmem>>, vector<1x8x32xf32>
    %105 = vector.shape_cast %104 : vector<1x8x32xf32> to vector<8x32xf32>
    %106 = vector.shape_cast %103 : vector<8x32xf32> to vector<1x8x32xf32>
    tpu.vector_store %arg14[%c0_45, %c0_46, %c0_47], %106 {strides = array<i32>} : memref<1x8x32xf32, #tpu.memory_space<vmem>>, vector<1x8x32xf32>,
    return
  }
  func.func @transform_0(%arg0: i32, %arg1: i32) -> (i32, i32, i32) {
    %c0_i32 = arith.constant 0 : i32
    %c0_i32_0 = arith.constant 0 : i32
    return %arg0, %arg1, %c0_i32 : i32, i32, i32
  }
  func.func @transform_1(%arg0: i32, %arg1: i32) -> (i32, i32, i32) {
    %c0_i32 = arith.constant 0 : i32
    %c0_i32_0 = arith.constant 0 : i32
    %c0_i32_1 = arith.constant 0 : i32
    return %arg0, %c0_i32, %c0_i32_0 : i32, i32, i32
  }
  func.func @transform_2(%arg0: i32, %arg1: i32) -> (i32, i32, i32) {
    %c0_i32 = arith.constant 0 : i32
    %c0_i32_0 = arith.constant 0 : i32
    %c0_i32_1 = arith.constant 0 : i32
    return %arg0, %c0_i32, %c0_i32_0 : i32, i32, i32
  }
  func.func @transform_3(%arg0: i32, %arg1: i32) -> (i32, i32, i32) {
    %c0_i32 = arith.constant 0 : i32
    %c0_i32_0 = arith.constant 0 : i32
    %c0_i32_1 = arith.constant 0 : i32
    return %c0_i32, %arg1, %c0_i32_0 : i32, i32, i32
  }
  func.func @transform_4(%arg0: i32, %arg1: i32) -> (i32, i32) {
    %c0_i32 = arith.constant 0 : i32
    %c0_i32_0 = arith.constant 0 : i32
    %c0_i32_1 = arith.constant 0 : i32
    return %c0_i32, %c0_i32_0 : i32, i32
  }
  func.func @transform_5(%arg0: i32, %arg1: i32) -> (i32, i32) {
    %c0_i32 = arith.constant 0 : i32
    %c0_i32_0 = arith.constant 0 : i32
    %c0_i32_1 = arith.constant 0 : i32
    return %c0_i32, %c0_i32_0 : i32, i32
  }
  func.func @transform_6(%arg0: i32, %arg1: i32) -> (i32, i32) {
    %c0_i32 = arith.constant 0 : i32
    %c0_i32_0 = arith.constant 0 : i32
    %c0_i32_1 = arith.constant 0 : i32
    return %c0_i32, %c0_i32_0 : i32, i32
  }
  func.func @transform_7(%arg0: i32, %arg1: i32) -> (i32, i32) {
    %c0_i32 = arith.constant 0 : i32
    %c0_i32_0 = arith.constant 0 : i32
    %c0_i32_1 = arith.constant 0 : i32
    return %c0_i32, %c0_i32_0 : i32, i32
  }
  func.func @transform_8(%arg0: i32, %arg1: i32) -> (i32, i32) {
    %c0_i32 = arith.constant 0 : i32
    %c0_i32_0 = arith.constant 0 : i32
    %c0_i32_1 = arith.constant 0 : i32
    return %c0_i32, %c0_i32_0 : i32, i32
  }
  func.func @transform_9(%arg0: i32, %arg1: i32) -> (i32, i32) {
    %c0_i32 = arith.constant 0 : i32
    %c0_i32_0 = arith.constant 0 : i32
    %c0_i32_1 = arith.constant 0 : i32
    return %c0_i32, %c0_i32_0 : i32, i32
  }
  func.func @transform_10(%arg0: i32, %arg1: i32) -> (i32, i32) {
    %c0_i32 = arith.constant 0 : i32
    %c0_i32_0 = arith.constant 0 : i32
    %c0_i32_1 = arith.constant 0 : i32
    return %c0_i32, %c0_i32_0 : i32, i32
  }
  func.func @transform_11(%arg0: i32, %arg1: i32) -> (i32, i32) {
    %c0_i32 = arith.constant 0 : i32
    %c0_i32_0 = arith.constant 0 : i32
    %c0_i32_1 = arith.constant 0 : i32
    return %c0_i32, %c0_i32_0 : i32, i32
  }
  func.func @transform_12(%arg0: i32, %arg1: i32) -> (i32, i32, i32) {
    %c0_i32 = arith.constant 0 : i32
    %c0_i32_0 = arith.constant 0 : i32
    return %arg0, %arg1, %c0_i32 : i32, i32, i32
  }
}

</mosaic_0001>

<bundles_post_ra>
// kernel: tpu_custom_call.1
= control target key start
LH: loop header
LB: loop body
LE: loop exit
PB: predicated region body
PF: predicated region fallthrough
CT: control target
= control target key end

     0   :  { %s2796_s0 = inlined_call_operand.hbm [shape: f32[2,8,32], index: 0, kind: input, shape index: {}]   ;;  %s2797_s1 = inlined_call_operand.hbm [shape: f32[2,8,32], index: 1, kind: input, shape index: {}]   ;;  %s2798_s2 = inlined_call_operand.hbm [shape: f32[2,8,32], index: 2, kind: input, shape index: {}]   ;;  %s2799_s3 = inlined_call_operand.vmem [shape: s8[1,8,8], index: 3, kind: input, shape index: {}]   ;;  %s2800_s4 = inlined_call_operand.hbm [shape: bf16[32,32], index: 4, kind: input, shape index: {}]   ;;  %s2801_s5 = inlined_call_operand.hbm [shape: f32[1,32], index: 5, kind: input, shape index: {}]   ;;  %s2802_s6 = inlined_call_operand.vmem [shape: bf16[32,32], index: 6, kind: input, shape index: {}]   ;;  %s2803_s7 = inlined_call_operand.hbm [shape: f32[1,32], index: 7, kind: input, shape index: {}]   ;;  %s2804_s8 = inlined_call_operand.hbm [shape: bf16[32,32], index: 8, kind: input, shape index: {}]   ;;  %s2805_s9 = inlined_call_operand.hbm [shape: f32[1,32], index: 9, kind: input, shape index: {}]   ;;  %s2806_s10 = inlined_call_operand.vmem [shape: bf16[32,32], index: 10, kind: input, shape index: {}]   ;;  %s2807_s11 = inlined_call_operand.vmem [shape: f32[1,32], index: 11, kind: input, shape index: {}]   ;;  %s2808_s12 = inlined_call_operand.hbm [shape: f32[2,8,32], index: 12, kind: output, shape index: {}]  }
   0x1   :  { %2834 = sst [smem:[#allocation34_spill]] %s2797_s1 }
   0x2   :  { %2835 = sst [smem:[#allocation35_spill]] %s2799_s3 }
   0x3   :  { %2836 = sst [smem:[#allocation36_spill]] %s2800_s4 }
   0x4   :  { %2837 = sst [smem:[#allocation37_spill]] %s2801_s5 }
   0x5   :  { %2838 = sst [smem:[#allocation38_spill]] %s2803_s7 }
   0x6   :  { %2839 = sst [smem:[#allocation39_spill]] %s2806_s10 }
   0x7   :  { %2840 = sst [smem:[#allocation40_spill]] %s2807_s11 }
   0x8   :  { %2841 = sst [smem:[#allocation41_spill]] %s2808_s12 }
   0x9   :  { %17 = vsyncpa [#allocation6], 0 }
   0xa   :  { %19 = vsyncpa [#allocation6 + $0x1], 0 }
   0xb   :  { %20 = vsyncpa [#allocation9], 0 }
   0xc   :  { %22 = vsyncpa [#allocation9 + $0x1], 0 }
   0xd   :  { %23 = vsyncpa [#allocation12], 0 }
   0xe   :  { %24 = vsyncpa [#allocation15], 0 }
   0xf   :  { %25 = vsyncpa [#allocation18], 0 }
  0x10   :  { %26 = vsyncpa [#allocation7], 0 }
  0x11   :  { %28 = vsyncpa [#allocation7 + $0x1], 0  ;;  %s2294_s21 = smov 0   ;;  %s2296_s22 = smov 0  }
  0x12   :  { %s2298_s23 = smov 0   ;;  %s2300_s24 = smov 0  }
  0x13   :  { %s2302_s25 = smov 0   ;;  %s2304_s26 = smov 0  }
  0x14 LB: > { %2842 = sst [smem:[#allocation26_spill]] %s2188_s21  ;;  %s2325_s27 = sadd.s32 4294967295, %s2208_s26   ;;  %s2208_s26 = sphi %s2304_s26, %s34_s26   ;;  %s2204_s25 = sphi %s2302_s25, %s2894_s25   ;;  %s2200_s24 = sphi %s2300_s24, %s2893_s24   ;;  %s2196_s23 = sphi %s2298_s23, %s2897_s23   ;;  %s2192_s22 = sphi %s2296_s22, %s2896_s22   ;;  %s2188_s21 = sphi %s2294_s21, %s2895_s21  }
  0x15   : > { %2843 = sst [smem:[#allocation27_spill]] %s2200_s24  ;;  %p1559_p0 = scmp.ge.s32.totalorder %s2208_s26, 1 }
  0x16   : > { %2844 = sst [smem:[#allocation28_spill]] %s2204_s25  ;;  %p2818_p1 = scmp.eq.s32.totalorder %s2325_s27, 0 }
  0x17   : > { %2845 = sst [smem:[#allocation29_spill]] %s2208_s26  ;;  %p353_p2 = scmp.lt.s32.totalorder %s2208_s26, 3 }
  0x18   : > { %s2210_s29 = smov [#allocation11]   ;;  %s2211_s14 = smov [#allocation14]  }
  0x19   : > { %p2330_p3 = pnand %p1559_p0, %p353_p2  ;;  %s372_s30 = sshll.u32 %s2210_s29, 4  ;;  %s2334_s30 = int_to_ptr.vmem [resolvable:$true] %s372_s30 }
  0x1a   : > { %s400_s15 = sshll.u32 %s2211_s14, 4  ;;  %s2848_s4 = sld [smem:[#allocation36_spill]]  ;;  %s2345_s15 = int_to_ptr.vmem [resolvable:$true] %s400_s15 }
  0x1b   : > { %s2846_s28 = scalar_select %p2330_p3, 1, 0 }
  0x1c   : > { %p1749_p4 = pneg %p2330_p3 }
  0x1e   : > { %p2341_p6 = pnand %p1749_p4, %p2818_p1 }
  0x20   : > { %s2847_s13 = scalar_select %p2341_p6, 1, 0 }
  0x21   : > { %s1880_s18 = scalar_lea.hbm %s2848_s4, 256  ;;  %p2355_p8 = pneg %p2341_p6 }
  0x22   : > { %p1881_p7 = scmp.ne.s32.totalorder %s2848_s4, %s1880_s18  ;;  %p1887_p11 = scmp.lt.u32.totalorder %s1880_s18, %s2848_s4 }
  0x23   : > { %s2849_s29 = scalar_select %p2355_p8, 1, 0 }
  0x24   : > { %p1883_p9 = pnand %p2355_p8, %p1881_p7 }
  0x26   : > { %p1884_p10 = pneg %p1883_p9 }
  0x28   : > { %p1889_p12 = pnand %p1887_p11, %p1884_p10 }
  0x2a   : > { %1892 = shalt.err (!%p1889_p12)
}
  0x2b   : > { %s1893_s16 = scalar_lea.vmem %s2334_s30, 256  ;;  %p1901_p4 = scmp.lt.s32.totalorder %s2334_s30, %s2334_s30 }
  0x2c   : > { %p1894_p13 = scmp.ne.s32.totalorder %s2334_s30, %s1893_s16  ;;  %p1902_p5 = scmp.lt.s32.totalorder %s1893_s16, %s1893_s16 }
  0x2e   : > { %p1896_p0 = pnand %p1894_p13, %p2355_p8  ;;  %p1903_p7 = por %p1902_p5, %p1901_p4 }
  0x30   : > { %p1897_p2 = pneg %p1896_p0 }
  0x32   : > { %p1904_p9 = pnand %p1903_p7, %p1897_p2 }
  0x34   : > { %1907 = shalt.err (!%p1904_p9)
}
  0x35   : > { %s2811_s17 = smov 64   ;;  %s2812_s12 = smov 4  }
  0x36   : > { %1752 = dma.hbm_to_vmem [thread:$0]  (!%p2341_p6), %s2848_s4, 256, %s2334_s30, [#allocation12], %s2811_s17, %s2811_s17, %s2812_s12  }
  0x37   : > { %s2850_s7 = sld [smem:[#allocation38_spill]] }
  0x3d   : > { %s1908_s16 = scalar_lea.hbm %s2850_s7, 16 }
  0x3e   : > { %p1909_p5 = scmp.ne.s32.totalorder %s2850_s7, %s1908_s16  ;;  %p1915_p12 = scmp.lt.u32.totalorder %s1908_s16, %s2850_s7 }
  0x40   : > { %p1911_p10 = pnand %p1909_p5, %p2355_p8 }
  0x42   : > { %p1912_p11 = pneg %p1911_p10 }
  0x44   : > { %p1917_p13 = pnand %p1915_p12, %p1912_p11 }
  0x46   : > { %1920 = shalt.err (!%p1917_p13)
}
  0x47   : > { %s1921_s30 = scalar_lea.vmem %s2345_s15, 16  ;;  %s1928_s11 = scalar_lea.vmem %s2345_s15, 32 }
  0x48   : > { %p1922_p0 = scmp.ne.s32.totalorder %s2345_s15, %s1921_s30  ;;  %p1929_p7 = scmp.lt.s32.totalorder %s2345_s15, %s2345_s15 }
  0x49   : > { %p1930_p9 = scmp.lt.s32.totalorder %s1928_s11, %s1921_s30 }
  0x4a   : > { %p1924_p2 = pnand %p1922_p0, %p2355_p8 }
  0x4b   : > { %p1931_p5 = por %p1930_p9, %p1929_p7 }
  0x4c   : > { %p1925_p4 = pneg %p1924_p2 }
  0x4e   : > { %p1932_p10 = pnand %p1931_p5, %p1925_p4 }
  0x50   : > { %1935 = shalt.err (!%p1932_p10)
}
  0x51   : > { %1758 = dma.hbm_to_vmem [thread:$0]  (!%p2341_p6), %s2850_s7, 16, %s2345_s15, [#allocation15]  }
  0x52   : > { %s1558_s24 = sadd.s32 4294967294, %s2208_s26   ;;  %s46_s18 = sadd.s32 1, %s2204_s25 }
  0x53   : > { %p48_p11 = scmp.ge.s32.totalorder %s46_s18, 2  ;;  %s55_s19 = sadd.s32 1, %s2196_s23 }
  0x54   : > { %p62_p12 = scmp.ne.s32.totalorder %s2196_s23, %s2192_s22  ;;  %p63_p13 = scmp.eq.s32.totalorder %s2208_s26, 0 }
  0x55   : > { %s2899_s18 = smov (%p48_p11, %s46_s18), 0  ;;  %p68_p2 = scmp.ne.s32.totalorder %s2192_s22, %s2188_s21 }
  0x56   : > { %2851 = sst [smem:[#allocation30_spill]] %s2899_s18  ;;  %p2411_p0 = por %p63_p13, %p62_p12 }
  0x57   : > { %s50_s15 = ssub.s32 %s2204_s25, %s2899_s18  ;;  %p340_p4 = scmp.eq.s32.totalorder %s2325_s27, 1 }
  0x58   : > { %p53_p7 = scmp.eq.s32.totalorder %s50_s15, 0  ;;  %p2422_p9 = por %p2818_p1, %p68_p2 }
  0x59   : > { %p2426_p5 = por %p340_p4, %p62_p12  ;;  %p346_p10 = scmp.eq.s32.totalorder %s1558_s24, 1 }
  0x5a   : > { %s2853_s14 = scalar_select %p2422_p9, 1, 0 }
  0x5b   : > { %s2854_s16 = scalar_select %p2426_p5, 1, 0 }
  0x5c   : > { %s2431_s30 = scalar_select %p53_p7, %s2196_s23, %s55_s19  }
  0x5d   : > { %2855 = sst [smem:[#allocation31_spill]] %s2854_s16  ;;  %p2433_p11 = por %p346_p10, %p68_p2 }
  0x5e   : > { %2856 = sst [smem:[#allocation32_spill]] %s2431_s30  ;;  %p1784_p13 = scmp.lt.s32.totalorder %s2208_s26, 2 }
  0x5f   : > { %s2857_s11 = scalar_select %p2433_p11, 1, 0 }
  0x60   : > { %s2813_s3 = sand.u32 1, %s2196_s23   ;;  %s2440_s10 = sshll.u32 %s2204_s25, 7 }
  0x61   : > { %2858 = sst [smem:[#allocation33_spill]] %s2857_s11  ;;  %s2444_s15 = sshll.u32 %s2813_s3, 3 }
  0x62   : > { %p2448_p12 = pnand %p1784_p13, %p2411_p0  ;;  %s460_s24 = sand.u32 1, %s2208_s26  }
  0x63   : > { %s2860_s1 = sld [smem:[#allocation34_spill]]  ;;  %s464_s7 = scalar_lea.vmem [#allocation8], %s2444_s15 }
  0x64   : > { %s2859_s17 = scalar_select %p2448_p12, 1, 0 }
  0x65   : > { %s471_s3 = sshll.u32 %s464_s7, 4  ;;  %s2462_s20 = scalar_lea.sflag [#allocation9], %s460_s24  ;;  %s2460_s3 = int_to_ptr.vmem [resolvable:$true] %s471_s3 }
  0x66   : > { %p2468_p2 = pneg %p2448_p12 }
  0x68   : > { %s2861_s25 = scalar_select %p2468_p2, 1, 0 }
  0x69   : > { %s2457_s4 = scalar_lea.hbm %s2860_s1, %s2440_s10  ;;  %s1941_s30 = scalar_lea.hbm %s2860_s1, 256 }
  0x6a   : > { %s1936_s18 = scalar_lea.hbm %s2457_s4, 128  ;;  %p1942_p10 = scmp.lt.u32.totalorder %s2457_s4, %s2860_s1 }
  0x6b   : > { %p1937_p0 = scmp.ne.s32.totalorder %s2457_s4, %s1936_s18  ;;  %p1943_p13 = scmp.lt.u32.totalorder %s1941_s30, %s1936_s18 }
  0x6c   : > { %p1945_p11 = scmp.lt.u32.totalorder %s1936_s18, %s2457_s4 }
  0x6d   : > { %p1939_p4 = pnand %p2468_p2, %p1937_p0  ;;  %p1944_p1 = por %p1943_p13, %p1942_p10 }
  0x6f   : > { %p1940_p7 = pneg %p1939_p4  ;;  %p1946_p5 = por %p1945_p11, %p1944_p1 }
  0x71   : > { %p1947_p9 = pnand %p1946_p5, %p1940_p7 }
  0x73   : > { %1950 = shalt.err (!%p1947_p9)
}
  0x74   : > { %s1951_s24 = scalar_lea.vmem %s2460_s3, 128  ;;  %s2214_s12 = smov [#allocation8]  }
  0x75   : > { %p1952_p0 = scmp.ne.s32.totalorder %s2460_s3, %s1951_s24  ;;  %s1956_s19 = sshll.u32 %s2214_s12, 4  ;;  %s1957_s19 = int_to_ptr.vmem [resolvable:$false] %s1956_s19 }
  0x76   : > { %s1958_s26 = scalar_lea.vmem %s1957_s19, 256  ;;  %p1959_p6 = scmp.lt.s32.totalorder %s2460_s3, %s1957_s19 }
  0x77   : > { %p1954_p4 = pnand %p1952_p0, %p2468_p2  ;;  %p1960_p8 = scmp.lt.s32.totalorder %s1958_s26, %s1951_s24 }
  0x79   : > { %p1955_p3 = pneg %p1954_p4  ;;  %p1961_p10 = por %p1960_p8, %p1959_p6 }
  0x7b   : > { %p1962_p13 = pnand %p1961_p10, %p1955_p3 }
  0x7d   : > { %1965 = shalt.err (!%p1962_p13)
}
  0x7e   : > { %1771 = dma.hbm_to_vmem [thread:$0]  (!%p2448_p12), %s2457_s4, 128, %s2460_s3, %s2462_s20  }
  0x7f   : > { %s2215_s18 = smov [#allocation13]   ;;  %s2216_s7 = smov [#allocation16]  }
  0x80   : > { %s386_s30 = sshll.u32 %s2215_s18, 4  ;;  %s410_s1 = sshll.u32 %s2216_s7, 4  ;;  %s387_s30 = int_to_ptr.vmem [resolvable:$true] %s386_s30  ;;  %s411_s1 = int_to_ptr.vmem [resolvable:$true] %s410_s1 }
  0x81   : > { %s2862_s5 = sld [smem:[#allocation37_spill]]  ;;  %p2863_p3 = scmp.ne.s32.totalorder %s2849_s29, 0 }
  0x87   : > { %s1966_s19 = scalar_lea.hbm %s2862_s5, 16 }
  0x88   : > { %p1967_p1 = scmp.ne.s32.totalorder %s2862_s5, %s1966_s19  ;;  %p1973_p9 = scmp.lt.u32.totalorder %s1966_s19, %s2862_s5 }
  0x8a   : > { %p1969_p6 = pnand %p1967_p1, %p2863_p3 }
  0x8c   : > { %p1970_p8 = pneg %p1969_p6 }
  0x8e   : > { %p1975_p5 = pnand %p1973_p9, %p1970_p8 }
  0x90   : > { %1978 = shalt.err (!%p1975_p5)
}
  0x91   : > { %s1979_s4 = scalar_lea.vmem %s387_s30, 16  ;;  %s1986_s11 = scalar_lea.vmem %s387_s30, 32 }
  0x92   : > { %p1980_p11 = scmp.ne.s32.totalorder %s387_s30, %s1979_s4  ;;  %p1987_p4 = scmp.lt.s32.totalorder %s387_s30, %s387_s30 }
  0x93   : > { %p1988_p10 = scmp.lt.s32.totalorder %s1986_s11, %s1979_s4 }
  0x94   : > { %p1982_p7 = pnand %p1980_p11, %p2863_p3 }
  0x95   : > { %p1989_p13 = por %p1988_p10, %p1987_p4 }
  0x96   : > { %p1983_p0 = pneg %p1982_p7 }
  0x98   : > { %p1990_p12 = pnand %p1989_p13, %p1983_p0 }
  0x9a   : > { %1993 = shalt.err (!%p1990_p12)
}
  0x9b   : > { %p2864_p1 = scmp.ne.s32.totalorder %s2847_s13, 0  ;;  %s1994_s7 = scalar_lea.hbm %s2804_s8, 256 }
  0x9c   : > { %p1995_p6 = scmp.ne.s32.totalorder %s2804_s8, %s1994_s7  ;;  %p2001_p12 = scmp.lt.u32.totalorder %s1994_s7, %s2804_s8 }
  0x9d   : > { %1755 = dma.hbm_to_vmem [thread:$0]  (!%p2864_p1), %s2862_s5, 16, %s387_s30, [#allocation12]  }
  0x9e   : > { %p1997_p8 = pnand %p1995_p6, %p2863_p3 }
  0xa0   : > { %p1998_p9 = pneg %p1997_p8 }
  0xa2   : > { %p2003_p5 = pnand %p2001_p12, %p1998_p9 }
  0xa4   : > { %2006 = shalt.err (!%p2003_p5)
}
  0xa5   : > { %s2007_s4 = scalar_lea.vmem %s411_s1, 256  ;;  %p2015_p4 = scmp.lt.s32.totalorder %s411_s1, %s411_s1 }
  0xa6   : > { %p2008_p11 = scmp.ne.s32.totalorder %s411_s1, %s2007_s4  ;;  %p2016_p10 = scmp.lt.s32.totalorder %s2007_s4, %s2007_s4 }
  0xa8   : > { %p2010_p7 = pnand %p2008_p11, %p2863_p3  ;;  %p2017_p13 = por %p2016_p10, %p2015_p4 }
  0xaa   : > { %p2011_p0 = pneg %p2010_p7 }
  0xac   : > { %p2018_p2 = pnand %p2017_p13, %p2011_p0 }
  0xae   : > { %2021 = shalt.err (!%p2018_p2)
}
  0xaf   : > { %s2865_s30 = smov 4   ;;  %s2866_s11 = smov 64  }
  0xb0   : > { %1761 = dma.hbm_to_vmem [thread:$0]  (!%p2864_p1), %s2804_s8, 256, %s411_s1, [#allocation15], %s2866_s11, %s2866_s11, %s2865_s30  }
  0xb1   : > { %s2217_s21 = smov [#allocation17]   ;;  %s2022_s19 = scalar_lea.hbm %s2805_s9, 16 }
  0xb2   : > { %s424_s16 = sshll.u32 %s2217_s21, 4  ;;  %p2023_p2 = scmp.ne.s32.totalorder %s2805_s9, %s2022_s19  ;;  %s425_s16 = int_to_ptr.vmem [resolvable:$true] %s424_s16 }
  0xb3   : > { %p2029_p9 = scmp.lt.u32.totalorder %s2022_s19, %s2805_s9 }
  0xb4   : > { %p2025_p6 = pnand %p2023_p2, %p2863_p3 }
  0xb6   : > { %p2026_p8 = pneg %p2025_p6 }
  0xb8   : > { %p2031_p12 = pnand %p2029_p9, %p2026_p8 }
  0xba   : > { %2034 = shalt.err (!%p2031_p12)
}
  0xbb   : > { %s2035_s1 = scalar_lea.vmem %s425_s16, 16  ;;  %s2042_s30 = scalar_lea.vmem %s425_s16, 32 }
  0xbc   : > { %p2036_p5 = scmp.ne.s32.totalorder %s425_s16, %s2035_s1  ;;  %p2043_p0 = scmp.lt.s32.totalorder %s425_s16, %s425_s16 }
  0xbd   : > { %p2044_p4 = scmp.lt.s32.totalorder %s2042_s30, %s2035_s1 }
  0xbe   : > { %p2038_p11 = pnand %p2036_p5, %p2863_p3 }
  0xbf   : > { %p2045_p10 = por %p2044_p4, %p2043_p0 }
  0xc0   : > { %p2039_p7 = pneg %p2038_p11 }
  0xc2   : > { %p2046_p13 = pnand %p2045_p10, %p2039_p7 }
  0xc4   : > { %2049 = shalt.err (!%p2046_p13)
}
  0xc5   : > { %1764 = dma.hbm_to_vmem [thread:$0]  (!%p2864_p1), %s2805_s9, 16, %s425_s16, [#allocation18]  }
  0xc6   : > { %s2553_s18 = scalar_lea.hbm %s2796_s0, %s2440_s10  ;;  %s445_s21 = scalar_lea.vmem [#allocation5], %s2444_s15 }
  0xc7   : > { %s453_s7 = sshll.u32 %s445_s21, 4  ;;  %s2867_s13 = sand.u32 1, %s2196_s23   ;;  %s454_s7 = int_to_ptr.vmem [resolvable:$true] %s453_s7 }
  0xc8   : > { %s442_s12 = scalar_lea.sflag [#allocation6], %s2867_s13  ;;  %s2050_s19 = scalar_lea.hbm %s2553_s18, 128 }
  0xc9   : > { %p2051_p3 = scmp.ne.s32.totalorder %s2553_s18, %s2050_s19  ;;  %p2868_p2 = scmp.ne.s32.totalorder %s2861_s25, 0 }
  0xca   : > { %s2055_s26 = scalar_lea.hbm %s2796_s0, 256  ;;  %p2056_p1 = scmp.lt.u32.totalorder %s2553_s18, %s2796_s0 }
  0xcb   : > { %p2053_p6 = pnand %p2051_p3, %p2868_p2  ;;  %p2057_p9 = scmp.lt.u32.totalorder %s2055_s26, %s2050_s19 }
  0xcc   : > { %p2059_p5 = scmp.lt.u32.totalorder %s2050_s19, %s2553_s18 }
  0xcd   : > { %p2054_p8 = pneg %p2053_p6  ;;  %p2058_p12 = por %p2057_p9, %p2056_p1 }
  0xcf   : > { %p2060_p11 = por %p2059_p5, %p2058_p12 }
  0xd1   : > { %p2061_p7 = pnand %p2060_p11, %p2054_p8 }
  0xd3   : > { %2064 = shalt.err (!%p2061_p7)
}
  0xd4   : > { %s2065_s30 = scalar_lea.vmem %s454_s7, 128  ;;  %s2218_s11 = smov [#allocation5]  }
  0xd5   : > { %p2066_p0 = scmp.ne.s32.totalorder %s454_s7, %s2065_s30  ;;  %s2070_s3 = sshll.u32 %s2218_s11, 4  ;;  %s2071_s3 = int_to_ptr.vmem [resolvable:$false] %s2070_s3 }
  0xd6   : > { %s2072_s5 = scalar_lea.vmem %s2071_s3, 256  ;;  %p2073_p13 = scmp.lt.s32.totalorder %s454_s7, %s2071_s3 }
  0xd7   : > { %p2068_p4 = pnand %p2066_p0, %p2868_p2  ;;  %p2074_p3 = scmp.lt.s32.totalorder %s2072_s5, %s2065_s30 }
  0xd9   : > { %p2069_p10 = pneg %p2068_p4  ;;  %p2075_p6 = por %p2074_p3, %p2073_p13 }
  0xdb   : > { %p2076_p1 = pnand %p2075_p6, %p2069_p10 }
  0xdd   : > { %2079 = shalt.err (!%p2076_p1)
}
  0xde   : > { %p2869_p9 = scmp.ne.s32.totalorder %s2859_s17, 0  ;;  %s2579_s13 = scalar_lea.hbm %s2798_s2, %s2440_s10 }
  0xdf   : > { %s482_s19 = scalar_lea.vmem [#allocation10], %s2444_s15  ;;  %s2080_s24 = scalar_lea.hbm %s2579_s13, 128 }
  0xe0   : > { %1768 = dma.hbm_to_vmem [thread:$0]  (!%p2869_p9), %s2553_s18, 128, %s454_s7, %s442_s12  }
  0xe1   : > { %s489_s16 = sshll.u32 %s482_s19, 4  ;;  %p2081_p8 = scmp.ne.s32.totalorder %s2579_s13, %s2080_s24  ;;  %s490_s16 = int_to_ptr.vmem [resolvable:$true] %s489_s16 }
  0xe2   : > { %s2085_s18 = scalar_lea.hbm %s2798_s2, 256  ;;  %p2086_p11 = scmp.lt.u32.totalorder %s2579_s13, %s2798_s2 }
  0xe3   : > { %p2083_p12 = pnand %p2081_p8, %p2868_p2  ;;  %p2087_p7 = scmp.lt.u32.totalorder %s2085_s18, %s2080_s24 }
  0xe4   : > { %p2089_p4 = scmp.lt.u32.totalorder %s2080_s24, %s2579_s13 }
  0xe5   : > { %p2084_p5 = pneg %p2083_p12  ;;  %p2088_p0 = por %p2087_p7, %p2086_p11 }
  0xe7   : > { %p2090_p10 = por %p2089_p4, %p2088_p0 }
  0xe9   : > { %p2091_p13 = pnand %p2090_p10, %p2084_p5 }
  0xeb   : > { %2094 = shalt.err (!%p2091_p13)
}
  0xec   : > { %s2095_s10 = scalar_lea.vmem %s490_s16, 128  ;;  %s2219_s15 = smov [#allocation10]  }
  0xed   : > { %p2096_p3 = scmp.ne.s32.totalorder %s490_s16, %s2095_s10  ;;  %s2100_s1 = sshll.u32 %s2219_s15, 4  ;;  %s2101_s1 = int_to_ptr.vmem [resolvable:$false] %s2100_s1 }
  0xee   : > { %s2102_s30 = scalar_lea.vmem %s2101_s1, 256  ;;  %p2103_p8 = scmp.lt.s32.totalorder %s490_s16, %s2101_s1 }
  0xef   : > { %p2098_p6 = pnand %p2096_p3, %p2868_p2  ;;  %p2104_p12 = scmp.lt.s32.totalorder %s2102_s30, %s2095_s10 }
  0xf1   : > { %p2099_p1 = pneg %p2098_p6  ;;  %p2105_p9 = por %p2104_p12, %p2103_p8 }
  0xf3   : > { %p2106_p7 = pnand %p2105_p9, %p2099_p1 }
  0xf5   : > { %2109 = shalt.err (!%p2106_p7)
}
  0xf6   : > { %p2870_p11 = scmp.ne.s32.totalorder %s2859_s17, 0  ;;  %p2871_p5 = scmp.ne.s32.totalorder %s2846_s28, 0 }
  0xf7   : > { %s2603_s25 = sand.u32 (!%p2871_p5), 1, %s2192_s22   ;;  %p2872_p2 = scmp.ne.s32.totalorder (!%p2871_p5), %s2853_s14, 0 }
  0xf8   : > { %1774 = dma.hbm_to_vmem [thread:$0]  (!%p2870_p11), %s2579_s13, 128, %s490_s16, %s2462_s20  }
  0xf9   : > { %498 = sbr.rel (%p2871_p5) target bundleno = 1741 (0x6cd), region = 68  ;;  %s2606_s11 = sshll.u32 (!%p2871_p5), %s2603_s25, 3 }
  0xfa   : > { %s501_s3 = scalar_lea.sflag (!%p2871_p5), [#allocation6], %s2603_s25  ;;  %s504_s5 = scalar_lea.vmem (!%p2871_p5), [#allocation5], %s2606_s11 }
 0x100   : > { %2163 = dma.done.wait (%p2872_p2), %s501_s3, 128  }
 0x101   : > { %2165 = vsyncadd (%p2872_p2), %s501_s3, 4294967168  ;;  %s509_s28 = sand.u32 1, %s2325_s27   ;;  %s513_s20 = scalar_lea.vmem [#allocation8], %s2606_s11 }
 0x102   : > { %s510_s17 = scalar_lea.sflag [#allocation9], %s509_s28 }
 0x103   : > { %2167 = dma.done.wait (%p2872_p2), %s510_s17, 256  }
 0x104   : > { %2169 = vsyncadd (%p2872_p2), %s510_s17, 4294967040  ;;  %s522_s29 = scalar_lea.vmem [#allocation10], %s2606_s11  ;;  %p2873_p9 = scmp.eq.s32.totalorder %s2325_s27, 0 }
 0x106   : > { %2171 = dma.done.wait (%p2873_p9), [#allocation12], 272   ;;  %p2874_p0 = pmov %p2873_p9 }
 0x108   : > { %2173 = vsyncadd (%p2874_p0), [#allocation12], 4294967024  ;;  %p2875_p4 = pmov %p2874_p0 }
 0x109   : > { %p2876_p10 = pmov %p2874_p0 }
 0x10a   : > { %2175 = dma.done.wait (%p2875_p4), [#allocation15], 272  }
 0x10b   : > { %2177 = vsyncadd (%p2876_p10), [#allocation15], 4294967024  ;;  %p2877_p13 = pmov %p2874_p0 }
 0x10c   : > { %p2878_p3 = pmov %p2874_p0 }
 0x10d   : > { %2179 = dma.done.wait (%p2877_p13), [#allocation18], 16  }
 0x10e   : > { %2181 = vsyncadd (%p2878_p3), [#allocation18], 4294967280  ;;  %v2220_v0 = vmov 0.0   ;;  %vm2221_vm0 = vmmov 0   ;;  %v1854_v1 = vld [vmem:[%s2802_s6] sm:$0xff]   ;;  %v1855_v2 = vld [vmem:[%s2802_s6 + $0x8] sm:$0xff]  }
 0x10f   : > { %1641 = vmatprep.subr.bf16.mxu0 %v2220_v0  ;;  %1645 = vmatprep.mubr.msk.bf16.mxu0 %vm2221_vm0, %v2220_v0  ;;  %v606_v3 = vld [vmem:[%s513_s20] sm:$0xff]  ;;  %vm633_vm1 = vcmask 261120   ;;  %v748_v7 = vld [vmem:[%s504_s5] sm:$0xff]  ;;  %vm744_vm2 = vcmask 257024   ;;  %vm825_vm3 = vcmask 64512   ;;  %s2222_s19 = smov 112  }
 0x110   : > { %1649 = vmatprep.subr.bf16.mxu1 %v2220_v0  ;;  %1653 = vmatprep.mubr.msk.bf16.mxu1 %vm2221_vm0, %v2220_v0  ;;  %v1856_v4 = vld [vmem:[#allocation11] sm:$0xff]   ;;  %v607_v5 = vpack.c.bf16 %v606_v3, %v606_v3  ;;  %v1857_v6 = vld [vmem:[#allocation11 + $0x8] sm:$0xff]   ;;  %v749_v8 = vpack.c.bf16 %v748_v7, %v748_v7  ;;  %v1858_v9 = vld [vmem:[#allocation16] sm:$0xff]   ;;  %s2223_s16 = smov 120   ;;  %s2224_s24 = smov 104   ;;  %vm887_vm4 = vcmask 1043456  }
 0x111   : > { %1642 = vmatpush3.bf16.msra.mxu0 %v1854_v1  ;;  %1650 = vmatpush3.bf16.msra.mxu1 %v1858_v9  ;;  %v1859_v10 = vld [vmem:[#allocation16 + $0x8] sm:$0xff]   ;;  %v1583_v13 = vld [vmem:[#allocation14] ss:$0 sm:$0xff]  ;;  %v1591_v20 = vld [vmem:[#allocation13] ss:$0 sm:$0xff]  ;;  %s2879_s18 = sld [smem:[#allocation35_spill]] }
 0x112   : > { %1643 = vmatprep.subr.bf16.mxu0 %v2220_v0  ;;  %1651 = vmatprep.subr.bf16.mxu1 %v2220_v0  ;;  %v608_v11 = vld [vmem:[%s522_s29] sm:$0xff]  ;;  %v1587_v30 = vld [vmem:[#allocation17] ss:$0 sm:$0xff]  ;;  %s2225_s7 = smov 8   ;;  %s2880_s15 = sld [smem:[#allocation39_spill]]  ;;  %vm1053_vm6 = vcmask 130112  }
 0x113   : > { %v609_v12 = vpack.c.bf16 %v608_v11, %v608_v11  ;;  %s2226_s3 = smov 16   ;;  %s2227_s5 = smov 24   ;;  %vm1169_vm7 = vcmask 195712   ;;  %vm1285_vm8 = vcmask 261312  }
 0x114   : > { %s2881_s28 = sld [smem:[#allocation27_spill]]  ;;  %s2882_s29 = sld [smem:[#allocation40_spill]] }
 0x115   : > { %1644 = vmatpush3.bf16.msra.mxu0 %v1855_v2  ;;  %1652 = vmatpush3.bf16.msra.mxu1 %v1859_v10  ;;  %s2883_s14 = sld [smem:[#allocation31_spill]]  ;;  %s596_s13 = scalar_lea.vmem [#allocation19], %s2606_s11 }
 0x116   : > { %1657 = vmatprep.subr.bf16.mxu0 %v2220_v0  ;;  %1665 = vmatprep.subr.bf16.mxu1 %v2220_v0  ;;  %s1371_s27 = sshll.u32 %s596_s13, 4  ;;  %s2748_s27 = int_to_ptr.vmem [resolvable:$true] %s1371_s27 }
 0x117   : > { %v817_v48 = vld [vmem:[%s2879_s18] sm:$0x3]  ;;  %s1357_s18 = scalar_lea.sflag [#allocation7], %s2603_s25  ;;  %s2110_s11 = scalar_lea.vmem %s2748_s27, 128 }
 0x118   : > { %1646 = vmatmul.mubr.msk.bf16.vlgmr.msra.gmra.mrb[0].mxu0 %vm633_vm1, %v607_v5  ;;  %1654 = vmatmul.mubr.msk.bf16.vlgmr.msra.gmra.mrb[0].mxu1 %vm633_vm1, %v609_v12  ;;  %v818_v49 = vunpack.c.0.s8 %v817_v48  ;;  %p2111_p6 = scmp.ne.s32.totalorder %s2748_s27, %s2110_s11 }
 0x119   : > { %1658 = vmatpush3.bf16.msra.mxu0 %v1856_v4  ;;  %1661 = vmatprep.mubr.msk.bf16.mxu0 %vm2221_vm0, %v2220_v0 }
 0x11a   : > { %1659 = vmatprep.subr.bf16.mxu0 %v2220_v0  ;;  %1667 = vmatprep.mubr.msk.bf16.mxu1 %vm2221_vm0, %v2220_v0  ;;  %v819_v50 = vcvt.s32.f32 %v818_v49  ;;  %s1610_s21 = sshll.u32 %s2881_s28, 7 }
 0x11b   : > { %p2886_p1 = scmp.ne.s32.totalorder %s2883_s14, 0 }
 0x11c   : > { %vm820_vm5 = vcmp.eq.f32.partialorder %v819_v50, 0.0 }
 0x11d   : > { %1660 = vmatpush3.bf16.msra.mxu0 %v1857_v6  ;;  %v821_v51 = vsel %vm820_vm5, -1e+09, %v2220_v0  ;;  %p2112_p8 = pnand %p2111_p6, %p2886_p1 }
 0x11e   : > { %1671 = vmatprep.subr.bf16.mxu0 %v2220_v0 }
 0x11f   : > { %p2113_p12 = pneg %p2112_p8 }
 0x120   : > { %1662 = vmatmul.mubr.msk.bf16.vlgmr.msra.gmra.mrb[4].mxu0 %vm633_vm1, %v749_v8 }
 0x121   : > { %1673 = vmatprep.mubr.msk.bf16.mxu0 %vm2221_vm0, %v2220_v0 }
 0x1eb   : > { %v671_v14 = vpop.f32.mrb[0].mxu0  ;;  %v737_v31 = vpop.f32.mrb[0].mxu1 }
 0x1ec   : > { %v672_v15 = vadd.f32 %v1583_v13, %v671_v14  ;;  %v1647_v16 = vpop.f32.mrb[1].mxu0  ;;  %v738_v32 = vadd.f32 %v1587_v30, %v737_v31  ;;  %v1655_v33 = vpop.f32.mrb[1].mxu1 }
 0x1ed   : > { %v674_v17 = vpop.f32.mrb[2].mxu0  ;;  %v740_v34 = vpop.f32.mrb[2].mxu1 }
 0x1ee   : > { %v743_v18 = vpack.c.bf16 %v672_v15, %v672_v15  ;;  %v1648_v19 = vpop.f32.mrb[3].mxu0  ;;  %v746_v35 = vpack.c.bf16 %v738_v32, %v738_v32  ;;  %v1656_v36 = vpop.f32.mrb[3].mxu1 }
 0x1f0   : > { %745 = vst.msk [vmem:[#allocation2] sm:$0xf] %vm744_vm2, %v743_v18  ;;  %747 = vst.msk [vmem:[#allocation3] sm:$0xf] %vm744_vm2, %v746_v35 }
 0x1f3   : > { %v811_v21 = vpop.f32.mrb[4].mxu0 }
 0x1f4   : > { %v1663_v22 = vpop.f32.mrb[5].mxu0  ;;  %v812_v24 = vadd.f32 %v1591_v20, %v811_v21 }
 0x1f5   : > { %v814_v23 = vpop.f32.mrb[6].mxu0 }
 0x1f6   : > { %v1664_v25 = vpop.f32.mrb[7].mxu0  ;;  %v824_v29 = vpack.c.bf16 %v812_v24, %v812_v24 }
 0x1f7   : > { %v822_v26 = vld [vmem:[#allocation2] sm:$0xf]  ;;  %v2677_v37 = vld [vmem:[#allocation3] sm:$0xf] }
 0x1f8   : > { %v830_v27 = vsel %vm825_vm3, %v822_v26, 0  ;;  %v1597_v28 = vcombine.low %v822_v26, %v822_v26  ;;  %v889_v38 = vsel %vm887_vm4, %v2677_v37, 0  ;;  %v1599_v18 = vcombine.low %v2677_v37, %v2677_v37 }
 0x1f9   : > { %1666 = vmatpush3.bf16.xpose.msra.mxu1 %v830_v27  ;;  %1672 = vmatpush3.bf16.msra.mxu0 %v889_v38 }
 0x1fa   : > { %1057 = vrot.lane.b32.xlu1 %v1597_v28, %s2222_s19  ;;  %938 = vrot.lane.b32.xlu0 %v1597_v28, %s2223_s16 }
 0x1fb   : > { %1677 = vmatprep.subr.bf16.mxu1 %v2220_v0  ;;  %1683 = vmatprep.subr.bf16.mxu0 %v2220_v0 }
 0x1fe   : > { %1055 = vrot.lane.b32.xlu1 %v824_v29, %s2222_s19  ;;  %933 = vrot.lane.b32.xlu0 %v824_v29, %s2223_s16 }
 0x200   : > { %1668 = vmatmul.mubr.msk.bf16.vlgmr.msra.gmra.mrb[4].mxu1 %vm825_vm3, %v824_v29 }
 0x201   : > { %1679 = vmatprep.mubr.msk.bf16.mxu1 %vm2221_vm0, %v2220_v0 }
 0x202   : > { %1171 = vrot.lane.b32.xlu1 %v824_v29, %s2224_s24  ;;  %1173 = vrot.lane.b32.xlu0 %v1597_v28, %s2224_s24 }
 0x26c   : > { %v939_v39 = vpop.permute.xlu0 %938  ;;  %v1058_v41 = vpop.permute.xlu1 %1057 }
 0x26d   : > { %v944_v40 = vsel %vm825_vm3, %v939_v39, 0  ;;  %v1063_v43 = vsel %vm825_vm3, %v1058_v41, 0 }
 0x26e   : > { %1678 = vmatpush3.bf16.xpose.msra.mxu1 %v944_v40 }
 0x26f   : > { %1689 = vmatprep.subr.bf16.mxu1 %v2220_v0 }
 0x270   : > { %v934_v42 = vpop.permute.xlu0 %933  ;;  %v1056_v45 = vpop.permute.xlu1 %1055 }
 0x274   : > { %v1174_v44 = vpop.permute.xlu0 %1173  ;;  %v1172_v47 = vpop.permute.xlu1 %1171 }
 0x275   : > { %1680 = vmatmul.mubr.msk.bf16.vlgmr.msra.gmra.mrb[8].mxu1 %vm825_vm3, %v934_v42  ;;  %v1179_v46 = vsel %vm825_vm3, %v1174_v44, 0 }
 0x276   : > { %1690 = vmatpush3.bf16.xpose.msra.mxu1 %v1063_v43  ;;  %1691 = vmatprep.mubr.msk.bf16.mxu1 %vm2221_vm0, %v2220_v0 }
 0x277   : > { %1701 = vmatprep.subr.bf16.mxu1 %v2220_v0 }
 0x27d   : > { %1692 = vmatmul.mubr.msk.bf16.vlgmr.msra.gmra.mrb[12].mxu1 %vm825_vm3, %v1056_v45 }
 0x27e   : > { %1702 = vmatpush3.bf16.xpose.msra.mxu1 %v1179_v46  ;;  %1703 = vmatprep.mubr.msk.bf16.mxu1 %vm2221_vm0, %v2220_v0 }
 0x27f   : > { %1713 = vmatprep.subr.bf16.mxu1 %v2220_v0 }
 0x285   : > { %1704 = vmatmul.mubr.msk.bf16.vlgmr.msra.gmra.mrb[16].mxu1 %vm825_vm3, %v1172_v47 }
 0x286   : > { %1717 = vmatprep.mubr.msk.bf16.mxu1 %vm2221_vm0, %v2220_v0 }
 0x2d3   : > { %v866_v52 = vpop.f32.mrb[4].mxu1 }
 0x2d4   : > { %v867_v53 = vadd.f32 %v866_v52, %v821_v51  ;;  %v1669_v54 = vpop.f32.mrb[5].mxu1 }
 0x2d5   : > { %v869_v55 = vpop.f32.mrb[6].mxu1 }
 0x2d6   : > { %v1670_v56 = vpop.f32.mrb[7].mxu1  ;;  %v872_v57 = vsel %vm825_vm3, %v867_v53, -inf }
 0x2d7   : > { %873 = vmax.xlane.f32.xlu0 %v872_v57 }
 0x348   : > { %v980_v58 = vpop.f32.mrb[8].mxu1 }
 0x349   : > { %v981_v59 = vadd.f32 %v980_v58, %v821_v51  ;;  %v1681_v60 = vpop.f32.mrb[9].mxu1 }
 0x34a   : > { %v983_v61 = vpop.f32.mrb[10].mxu1 }
 0x34b   : > { %v1682_v62 = vpop.f32.mrb[11].mxu1  ;;  %v986_v63 = vsel %vm825_vm3, %v981_v59, -inf }
 0x34c   : > { %987 = vmax.xlane.f32.xlu1 %v986_v63 }
 0x350   : > { %v1099_v1 = vpop.f32.mrb[12].mxu1 }
 0x351   : > { %v1100_v2 = vadd.f32 %v1099_v1, %v821_v51  ;;  %v1693_v3 = vpop.f32.mrb[13].mxu1  ;;  %v1862_v1 = vld [vmem:[%s2880_s15] sm:$0xff]  }
 0x352   : > { %v1102_v4 = vpop.f32.mrb[14].mxu1  ;;  %1714 = vmatpush3.bf16.msra.mxu1 %v1862_v1 }
 0x353   : > { %v1694_v5 = vpop.f32.mrb[15].mxu1  ;;  %v1105_v6 = vsel %vm825_vm3, %v1100_v2, -inf  ;;  %1715 = vmatprep.subr.bf16.mxu1 %v2220_v0 }
 0x354   : > { %1106 = vmax.xlane.f32.xlu0 %v1105_v6 }
 0x358   : > { %v1215_v7 = vpop.f32.mrb[16].mxu1 }
 0x359   : > { %v1216_v8 = vadd.f32 %v1215_v7, %v821_v51  ;;  %v1705_v9 = vpop.f32.mrb[17].mxu1 }
 0x35a   : > { %v1218_v10 = vpop.f32.mrb[18].mxu1 }
 0x35b   : > { %v1706_v11 = vpop.f32.mrb[19].mxu1  ;;  %v1221_v12 = vsel %vm825_vm3, %v1216_v8, -inf }
 0x35c   : > { %1222 = vmax.xlane.f32.xlu0 %v1221_v12 }
 0x364   : > { %v874_v13 = vpop.xlane.xlu0 %873 }
 0x365   : > { %v875_v14 = vsub.f32 %v867_v53, %v874_v13 }
 0x367   : > { %v876_v15 = vmul.f32 1.442695, %v875_v14 }
 0x369   : > { %1864 = vpow2.f32 %v876_v15  ;;  %v1605_v15 = vld [vmem:[%s2882_s29] ss:$0 sm:$0xff] }
 0x373   : > { %v1865_v16 = vpop.eup %1864 }
 0x374   : > { %v878_v17 = vsel %vm825_vm3, %v1865_v16, 0.0 }
 0x375   : > { %879 = vadd.xlane.f32.xlu1 %v878_v17 }
 0x386   : > { %1001 = vrot.lane.b32.xlu1 %v1599_v18, %s2223_s16 }
 0x3d9   : > { %v988_v19 = vpop.xlane.xlu1 %987 }
 0x3da   : > { %v989_v20 = vsub.f32 %v981_v59, %v988_v19 }
 0x3dc   : > { %v990_v21 = vmul.f32 1.442695, %v989_v20 }
 0x3de   : > { %1866 = vpow2.f32 %v990_v21 }
 0x3e1   : > { %v1107_v22 = vpop.xlane.xlu0 %1106 }
 0x3e2   : > { %v1108_v23 = vsub.f32 %v1100_v2, %v1107_v22  ;;  %v1863_v2 = vld [vmem:[%s2880_s15 + $0x8] sm:$0xff]  }
 0x3e3   : > { %1716 = vmatpush3.bf16.msra.mxu1 %v1863_v2 }
 0x3e4   : > { %v1109_v24 = vmul.f32 1.442695, %v1108_v23 }
 0x3e6   : > { %1868 = vpow2.f32 %v1109_v24 }
 0x3e8   : > { %v1867_v25 = vpop.eup %1866 }
 0x3e9   : > { %v1223_v26 = vpop.xlane.xlu0 %1222  ;;  %v992_v27 = vsel %vm825_vm3, %v1867_v25, 0.0 }
 0x3ea   : > { %v1224_v28 = vsub.f32 %v1216_v8, %v1223_v26  ;;  %993 = vadd.xlane.f32.xlu0 %v992_v27 }
 0x3ec   : > { %v1225_v29 = vmul.f32 1.442695, %v1224_v28 }
 0x3ee   : > { %1870 = vpow2.f32 %v1225_v29 }
 0x3f0   : > { %v1869_v30 = vpop.eup %1868 }
 0x3f1   : > { %v1111_v31 = vsel %vm825_vm3, %v1869_v30, 0.0 }
 0x3f2   : > { %1112 = vadd.xlane.f32.xlu1 %v1111_v31 }
 0x3f8   : > { %v1871_v32 = vpop.eup %1870 }
 0x3f9   : > { %v1227_v33 = vsel %vm825_vm3, %v1871_v32, 0.0 }
 0x3fa   : > { %1228 = vadd.xlane.f32.xlu0 %v1227_v33 }
 0x402   : > { %v880_v34 = vpop.xlane.xlu1 %879 }
 0x403   : > { %1872 = vrcp.f32 %v880_v34  ;;  %1233 = vrot.lane.b32.xlu1 %v1599_v18, %s2224_s24  ;;  %s2884_s24 = sld [smem:[#allocation41_spill]] }
 0x406   : > { %v1002_v37 = vpop.permute.xlu1 %1001 }
 0x407   : > { %v1007_v39 = vsel %vm887_vm4, %v1002_v37, 0 }
 0x409   : > { %s2885_s4 = smov %s2884_s24  ;;  %s2746_s26 = scalar_lea.hbm %s2884_s24, %s1610_s21 }
 0x40d   : > { %v1873_v35 = vpop.eup %1872 }
 0x40e   : > { %v882_v36 = vmul.f32 %v1873_v35, %v1865_v16 }
 0x410   : > { %1117 = vrot.lane.b32.xlu0 %v1599_v18, %s2222_s19  ;;  %v883_v38 = vpack.c.bf16 %v882_v36, %v882_v36 }
 0x412   : > { %1674 = vmatmul.mubr.msk.bf16.vlgmr.msra.gmra.mrb[8].mxu0 %vm825_vm3, %v883_v38 }
 0x413   : > { %1684 = vmatpush3.bf16.msra.mxu0 %v1007_v39  ;;  %1685 = vmatprep.mubr.msk.bf16.mxu0 %vm2221_vm0, %v2220_v0 }
 0x414   : > { %1695 = vmatprep.subr.bf16.mxu0 %v2220_v0 }
 0x477   : > { %v994_v40 = vpop.xlane.xlu0 %993 }
 0x478   : > { %1874 = vrcp.f32 %v994_v40 }
 0x47f   : > { %v1113_v41 = vpop.xlane.xlu1 %1112 }
 0x480   : > { %1876 = vrcp.f32 %v1113_v41 }
 0x482   : > { %v1875_v42 = vpop.eup %1874 }
 0x483   : > { %v996_v43 = vmul.f32 %v1875_v42, %v1867_v25  ;;  %v1234_v50 = vpop.permute.xlu1 %1233 }
 0x484   : > { %v1239_v52 = vsel %vm887_vm4, %v1234_v50, 0 }
 0x485   : > { %v997_v44 = vpack.c.bf16 %v996_v43, %v996_v43 }
 0x487   : > { %1686 = vmatmul.mubr.msk.bf16.vlgmr.msra.gmra.mrb[12].mxu0 %vm825_vm3, %v997_v44  ;;  %v1229_v45 = vpop.xlane.xlu0 %1228 }
 0x488   : > { %1878 = vrcp.f32 %v1229_v45  ;;  %1697 = vmatprep.mubr.msk.bf16.mxu0 %vm2221_vm0, %v2220_v0 }
 0x48a   : > { %v1877_v46 = vpop.eup %1876 }
 0x48b   : > { %v1115_v47 = vmul.f32 %v1877_v46, %v1869_v30  ;;  %v1118_v48 = vpop.permute.xlu0 %1117 }
 0x48c   : > { %v1123_v49 = vsel %vm887_vm4, %v1118_v48, 0 }
 0x48d   : > { %1696 = vmatpush3.bf16.msra.mxu0 %v1123_v49  ;;  %v1116_v51 = vpack.c.bf16 %v1115_v47, %v1115_v47 }
 0x48e   : > { %1707 = vmatprep.subr.bf16.mxu0 %v2220_v0 }
 0x490   : > { %1698 = vmatmul.mubr.msk.bf16.vlgmr.msra.gmra.mrb[16].mxu0 %vm825_vm3, %v1116_v51 }
 0x491   : > { %1708 = vmatpush3.bf16.msra.mxu0 %v1239_v52  ;;  %1709 = vmatprep.mubr.msk.bf16.mxu0 %vm2221_vm0, %v2220_v0 }
 0x492   : > { %v1879_v53 = vpop.eup %1878 }
 0x493   : > { %v1231_v54 = vmul.f32 %v1879_v53, %v1871_v32 }
 0x495   : > { %v1232_v55 = vpack.c.bf16 %v1231_v54, %v1231_v54 }
 0x498   : > { %1710 = vmatmul.mubr.msk.bf16.vlgmr.msra.gmra.mrb[20].mxu0 %vm825_vm3, %v1232_v55 }
 0x4e5   : > { %v925_v56 = vpop.f32.mrb[8].mxu0 }
 0x4e6   : > { %931 = vst.msk [vmem:[#allocation4] sm:$0xff] %vm825_vm3, %v925_v56  ;;  %v1675_v57 = vpop.f32.mrb[9].mxu0 }
 0x4e7   : > { %v928_v58 = vpop.f32.mrb[10].mxu0 }
 0x4e8   : > { %v1676_v59 = vpop.f32.mrb[11].mxu0 }
 0x55a   : > { %v1043_v60 = vpop.f32.mrb[12].mxu0 }
 0x55b   : > { %1050 = vrot.lane.b32.xlu1 %v1043_v60, %s2225_s7  ;;  %v1687_v61 = vpop.f32.mrb[13].mxu0  ;;  %s2228_s7 = smov [#allocation19]  }
 0x55c   : > { %v1046_v62 = vpop.f32.mrb[14].mxu0  ;;  %s2114_s12 = sshll.u32 %s2228_s7, 4  ;;  %s2115_s12 = int_to_ptr.vmem [resolvable:$false] %s2114_s12 }
 0x55d   : > { %v1688_v63 = vpop.f32.mrb[15].mxu0  ;;  %s2116_s10 = scalar_lea.vmem %s2115_s12, 256  ;;  %p2117_p7 = scmp.lt.s32.totalorder %s2748_s27, %s2115_s12 }
 0x55e   : > { %p2118_p11 = scmp.lt.s32.totalorder %s2116_s10, %s2110_s11 }
 0x560   : > { %p2119_p5 = por %p2118_p11, %p2117_p7 }
 0x562   : > { %p2120_p2 = pnand %p2119_p5, %p2113_p12 }
 0x563   : > { %v1159_v3 = vpop.f32.mrb[16].mxu0 }
 0x564   : > { %1166 = vrot.lane.b32.xlu0 %v1159_v3, %s2226_s3  ;;  %v1699_v4 = vpop.f32.mrb[17].mxu0 }
 0x565   : > { %v1162_v5 = vpop.f32.mrb[18].mxu0 }
 0x566   : > { %v1700_v6 = vpop.f32.mrb[19].mxu0 }
 0x56b   : > { %v1275_v7 = vpop.f32.mrb[20].mxu0 }
 0x56c   : > { %1282 = vrot.lane.b32.xlu1 %v1275_v7, %s2227_s5  ;;  %v1711_v8 = vpop.f32.mrb[21].mxu0 }
 0x56d   : > { %v1278_v9 = vpop.f32.mrb[22].mxu0 }
 0x56e   : > { %v1712_v10 = vpop.f32.mrb[23].mxu0 }
 0x5cd   : > { %v1051_v11 = vpop.permute.xlu1 %1050 }
 0x5ce   : > { %1054 = vst.msk [vmem:[#allocation4] sm:$0xff] %vm1053_vm6, %v1051_v11 }
 0x5d6   : > { %v1167_v0 = vpop.permute.xlu0 %1166 }
 0x5d7   : > { %1170 = vst.msk [vmem:[#allocation4] sm:$0xff] %vm1169_vm7, %v1167_v0 }
 0x5de   : > { %v1283_v12 = vpop.permute.xlu1 %1282 }
 0x5df   : > { %1286 = vst.msk [vmem:[#allocation4] sm:$0xff] %vm1285_vm8, %v1283_v12 }
 0x5e6   : > { %v1287_v13 = vld [vmem:[#allocation4] sm:$0xff] }
 0x5e7   : > { %v1288_v14 = vpack.c.bf16 %v1287_v13, %v1287_v13 }
 0x5e9   : > { %1718 = vmatmul.mubr.msk.bf16.vlgmr.msra.gmra.mrb[20].mxu1 %vm633_vm1, %v1288_v14 }
 0x6bc   : > { %v1349_v16 = vpop.f32.mrb[20].mxu1 }
 0x6bd   : > { %v1350_v17 = vadd.f32 %v1605_v15, %v1349_v16  ;;  %v1719_v18 = vpop.f32.mrb[21].mxu1 }
 0x6be   : > { %v1352_v19 = vpop.f32.mrb[22].mxu1 }
 0x6bf   : > { %v1720_v20 = vpop.f32.mrb[23].mxu1  ;;  %1355 = vst.msk [vmem:[%s596_s13] sm:$0xff] %vm633_vm1, %v1350_v17 }
 0x6c0   : > { %2123 = shalt.err (!%p2120_p2)
}
 0x6c1   : > { %s2124_s25 = scalar_lea.hbm %s2746_s26, 128  ;;  %s2128_s3 = scalar_lea.hbm %s2885_s4, 256 }
 0x6c2   : > { %p2125_p9 = scmp.ne.s32.totalorder %s2746_s26, %s2124_s25  ;;  %p2129_p10 = scmp.lt.u32.totalorder %s2746_s26, %s2885_s4 }
 0x6c3   : > { %p2130_p13 = scmp.lt.u32.totalorder %s2128_s3, %s2124_s25  ;;  %p2132_p6 = scmp.lt.u32.totalorder %s2124_s25, %s2746_s26 }
 0x6c4   : > { %p2126_p0 = pnand %p2125_p9, %p2886_p1 }
 0x6c5   : > { %p2131_p3 = por %p2130_p13, %p2129_p10 }
 0x6c6   : > { %p2127_p4 = pneg %p2126_p0 }
 0x6c7   : > { %p2133_p8 = por %p2132_p6, %p2131_p3 }
 0x6c9   : > { %p2134_p12 = pnand %p2133_p8, %p2127_p4 }
 0x6cb   : > { %2137 = shalt.err (!%p2134_p12)
}
 0x6cc   : > { %1747 = dma.vmem_to_hbm [thread:$0]  (%p2886_p1), %s2748_s27, 128, %s2746_s26, %s1357_s18  }
 0x6cd PF: > { %s2887_s17 = sld [smem:[#allocation26_spill]]  ;;  %s2888_s20 = sld [smem:[#allocation33_spill]] }
 0x6ce   : > { %s2889_s29 = sld [smem:[#allocation29_spill]] }
 0x6d3   : > { %s1383_s21 = sand.u32 1, %s2887_s17   ;;  %p2890_p7 = scmp.ne.s32.totalorder %s2888_s20, 0 }
 0x6d4   : > { %p2891_p11 = scmp.ge.s32.totalorder %s2889_s29, 2  ;;  %s1384_s13 = scalar_lea.sflag [#allocation7], %s1383_s21 }
 0x6d6   : > { %p1776_p5 = pnand %p2891_p11, %p2890_p7 }
 0x6d8   : > { %2183 = dma.done.wait (!%p1776_p5), %s1384_s13, 128  }
 0x6d9   : > { %2185 = vsyncadd (!%p1776_p5), %s1384_s13, 4294967168  ;;  %s34_s26 = sadd.s32 1, %s2889_s29   ;;  %s2892_s14 = sld [smem:[#allocation32_spill]] }
 0x6da   : > { %p31_p2 = scmp.ge.s32.totalorder %s34_s26, 4   ;;  %s2893_s24 = sld [smem:[#allocation28_spill]] }
 0x6db   : > { %s2894_s25 = sld [smem:[#allocation30_spill]]  ;;  %s2895_s21 = smov %s2192_s22 }
 0x6dc   : > { %s2896_s22 = smov %s2196_s23  ;;  %33 = sbr.rel (!%p31_p2) target bundleno = 20 (0x14), region = 164 }
 0x6df   : > { %s2897_s23 = smov %s2892_s14 }
 0x6e3   :  { %1389 = vsyncpa [#allocation6], 1 }
 0x6e4   :  { %1391 = vsyncpa [#allocation6 + $0x1], 1 }
 0x6e5   :  { %1392 = vsyncpa [#allocation9], 1 }
 0x6e6   :  { %1394 = vsyncpa [#allocation9 + $0x1], 1 }
 0x6e7   :  { %1395 = vsyncpa [#allocation12], 1 }
 0x6e8   :  { %1396 = vsyncpa [#allocation15], 1 }
 0x6e9   :  { %1397 = vsyncpa [#allocation18], 1 }
 0x6ea   :  { %1398 = vsyncpa [#allocation7], 1 }
 0x6eb   :  { %1400 = vsyncpa [#allocation7 + $0x1], 1 }

</bundles_post_ra>
